<compile_context>
chip_gen: v5e
topology: v5e:2x2
jax: 0.10.0
libtpu: 0.0.40
codegen_flags: <defaults>
</compile_context>

<pallas_src>
import jax
import jax.numpy as jnp
from jax.experimental import pallas as pl
from jax.experimental.pallas import tpu as pltpu  # noqa: F401  (TPU backend)


# ----------------------------------------------------------------------------
# Single fused kernel: x -> (r, p, pi)
# ----------------------------------------------------------------------------
def _decoder_dense_kernel(x_ref, w1_ref, b1_ref, g1_ref, be1_ref,
                          w2_ref, b2_ref, g2_ref, be2_ref,
                          wh_ref, bh_ref,
                          r_ref, p_ref, pi_ref):
    out_dim = r_ref.shape[1]

    # --- layer1: Linear -> LeakyReLU(0.2) -> BatchNorm1d (batch stats) -------
    h = jnp.dot(x_ref[...], w1_ref[...],
                preferred_element_type=jnp.float32) + b1_ref[...]
    h = jnp.where(h >= 0, h, 0.2 * h)
    mean = jnp.mean(h, axis=0, keepdims=True)
    var = jnp.mean((h - mean) ** 2, axis=0, keepdims=True)          # biased var
    h = (h - mean) * jax.lax.rsqrt(var + 1e-5) * g1_ref[...] + be1_ref[...]

    # --- layer2: Linear -> LeakyReLU(0.2) -> BatchNorm1d (batch stats) -------
    h = jnp.dot(h, w2_ref[...],
                preferred_element_type=jnp.float32) + b2_ref[...]
    h = jnp.where(h >= 0, h, 0.2 * h)
    mean = jnp.mean(h, axis=0, keepdims=True)
    var = jnp.mean((h - mean) ** 2, axis=0, keepdims=True)
    h = (h - mean) * jax.lax.rsqrt(var + 1e-5) * g2_ref[...] + be2_ref[...]

    # --- fused NB heads: single (bs, hid2) @ (hid2, 3*out_dim) matmul --------
    z = jnp.dot(h, wh_ref[...],
                preferred_element_type=jnp.float32) + bh_ref[...]
    # Clamp r logits so exp() / downstream Gamma sampling stays finite.
    r_ref[...] = jnp.exp(jnp.clip(z[:, :out_dim], -30.0, 30.0))
    p_ref[...] = jax.nn.sigmoid(z[:, out_dim:2 * out_dim])
    pi_ref[...] = jax.nn.sigmoid(z[:, 2 * out_dim:])


def _full_spec(shape):
    zeros = (0,) * len(shape)
    return pl.BlockSpec(shape, lambda zeros=zeros: zeros)


def decoder_dense(params, x):
    bs, in_dim = x.shape
    hid = params["w1"].shape[1]
    hid2 = params["w2"].shape[1]
    out_dim = params["wh"].shape[1] // 3

    out_sds = jax.ShapeDtypeStruct((bs, out_dim), jnp.float32)
    return pl.pallas_call(
        _decoder_dense_kernel,
        out_shape=(out_sds, out_sds, out_sds),
        in_specs=[
            _full_spec((bs, in_dim)),
            _full_spec((in_dim, hid)), _full_spec((1, hid)),
            _full_spec((1, hid)), _full_spec((1, hid)),
            _full_spec((hid, hid2)), _full_spec((1, hid2)),
            _full_spec((1, hid2)), _full_spec((1, hid2)),
            _full_spec((hid2, 3 * out_dim)), _full_spec((1, 3 * out_dim)),
        ],
        out_specs=(_full_spec((bs, out_dim)),) * 3,
    )(x, params["w1"], params["b1"], params["g1"], params["be1"],
      params["w2"], params["b2"], params["g2"], params["be2"],
      params["wh"], params["bh"])


# ----------------------------------------------------------------------------
# Parameter construction (deterministic, PyTorch-style uniform init)
# ----------------------------------------------------------------------------
def _linear_params(key, in_dim, out_dim):
    kw, kb = jax.random.split(key)
    bound = 1.0 / jnp.sqrt(in_dim)
    w = jax.random.uniform(kw, (in_dim, out_dim), jnp.float32, -bound, bound)
    b = jax.random.uniform(kb, (1, out_dim), jnp.float32, -bound, bound)
    return w, b


def make_params(key, in_dim, hid_dim, hid_dim2, out_dim):
    keys = jax.random.split(key, 5)
    w1, b1 = _linear_params(keys[0], in_dim, hid_dim)
    w2, b2 = _linear_params(keys[1], hid_dim, hid_dim2)
    wr, br = _linear_params(keys[2], hid_dim2, out_dim)
    wp, bp = _linear_params(keys[3], hid_dim2, out_dim)
    wpi, bpi = _linear_params(keys[4], hid_dim2, out_dim)
    # Concatenated head weights: one wide matmul (r | p | pi).
    wh = jnp.concatenate([wr, wp, wpi], axis=1)
    bh = jnp.concatenate([br, bp, bpi], axis=1)
    # BatchNorm1d defaults: gamma=1, beta=0.
    return dict(
        w1=w1, b1=b1,
        g1=jnp.ones((1, hid_dim), jnp.float32),
        be1=jnp.zeros((1, hid_dim), jnp.float32),
        w2=w2, b2=b2,
        g2=jnp.ones((1, hid_dim2), jnp.float32),
        be2=jnp.zeros((1, hid_dim2), jnp.float32),
        wh=wh, bh=bh,
    )


# ----------------------------------------------------------------------------
# Full forward pass
# ----------------------------------------------------------------------------
@jax.jit
def decoder_profile_forward(params, x, sample_key):
    r, p, pi = decoder_dense(params, x)

    # TODO(synk): Gamma/Poisson rejection samplers have no clean Pallas
    # equivalent; the sampling glue stays in plain JAX and XLA fuses the
    # elementwise zero-inflation combine + log1p with the sampler epilogue.
    kg, kpo, kb, kn = jax.random.split(sample_key, 4)
    # Gamma(concentration=r, rate=r/p)  ==  standard_gamma(r) * (p / r)
    gamma_sample = jax.random.gamma(kg, r) * (p / r)
    pois_sample = jax.random.poisson(kpo, gamma_sample).astype(jnp.float32)
    bern_sample = jax.random.bernoulli(kb, pi).astype(jnp.float32)
    noise = jax.random.normal(kn, pois_sample.shape, jnp.float32)

    is_zero = noise <= bern_sample
    sample = jnp.where(is_zero, jnp.zeros_like(pois_sample), pois_sample)
    return jnp.log(sample + 1.0)


if __name__ == "__main__":
    # Small shapes consistent with the module (in < hid < hid2 < out),
    # batch >= 2 so training-mode BatchNorm batch statistics are well defined.
    BS, IN_DIM, HID, HID2, OUT = 8, 64, 128, 256, 512

    root = jax.random.PRNGKey(0)
    k_params, k_x, k_sample = jax.random.split(root, 3)

    params = make_params(k_params, IN_DIM, HID, HID2, OUT)
    x = jax.random.normal(k_x, (BS, IN_DIM), jnp.float32)

    out = decoder_profile_forward(params, x, k_sample)
    out = jax.block_until_ready(out)

    assert out.shape == (BS, OUT) and out.dtype == jnp.float32
    assert bool(jnp.all(jnp.isfinite(out)))
    assert bool(jnp.all(out >= 0.0))  # log(count + 1) is non-negative
    print("KERNEL_OK")
</pallas_src>

<mosaic_0001>
module attributes {stable_mosaic.version = 11 : i64} {
  func.func @_decoder_dense_kernel(%arg0: memref<8x64xf32, #tpu.memory_space<vmem>>, %arg1: memref<64x128xf32, #tpu.memory_space<vmem>>, %arg2: memref<1x128xf32, #tpu.memory_space<vmem>>, %arg3: memref<1x128xf32, #tpu.memory_space<vmem>>, %arg4: memref<1x128xf32, #tpu.memory_space<vmem>>, %arg5: memref<128x256xf32, #tpu.memory_space<vmem>>, %arg6: memref<1x256xf32, #tpu.memory_space<vmem>>, %arg7: memref<1x256xf32, #tpu.memory_space<vmem>>, %arg8: memref<1x256xf32, #tpu.memory_space<vmem>>, %arg9: memref<256x1536xf32, #tpu.memory_space<vmem>>, %arg10: memref<1x1536xf32, #tpu.memory_space<vmem>>, %arg11: memref<8x512xf32, #tpu.memory_space<vmem>>, %arg12: memref<8x512xf32, #tpu.memory_space<vmem>>, %arg13: memref<8x512xf32, #tpu.memory_space<vmem>>) attributes {dimension_semantics = [], scalar_prefetch = 0 : i64, scratch_operands = 0 : i64, tpu.core_type = #tpu.core_type<tc>} {
    %c0 = arith.constant 0 : index
    %c0_0 = arith.constant 0 : index
    %0 = vector.load %arg0[%c0, %c0_0] : memref<8x64xf32, #tpu.memory_space<vmem>>, vector<8x64xf32>
    %c0_1 = arith.constant 0 : index
    %c0_2 = arith.constant 0 : index
    %1 = vector.load %arg1[%c0_1, %c0_2] : memref<64x128xf32, #tpu.memory_space<vmem>>, vector<64x128xf32>
    %cst = arith.constant dense<0.000000e+00> : vector<8x128xf32>
    %2 = tpu.matmul %0, %1, %cst {dimension_numbers = #tpu.dot_dimension_numbers<[1], [0], [0], [1], [0, 0, 1, 1], [], []>} : vector<8x64xf32>, vector<64x128xf32>, vector<8x128xf32> -> vector<8x128xf32>
    %c0_3 = arith.constant 0 : index
    %c0_4 = arith.constant 0 : index
    %3 = vector.load %arg2[%c0_3, %c0_4] : memref<1x128xf32, #tpu.memory_space<vmem>>, vector<1x128xf32>
    %4 = vector.broadcast %3 : vector<1x128xf32> to vector<8x128xf32>
    %5 = arith.addf %2, %4 : vector<8x128xf32>
    %cst_5 = arith.constant 0.000000e+00 : f32
    %6 = vector.broadcast %cst_5 : f32 to vector<8x128xf32>
    %7 = arith.cmpf oge, %5, %6 : vector<8x128xf32>
    %cst_6 = arith.constant 2.000000e-01 : f32
    %8 = vector.broadcast %cst_6 : f32 to vector<8x128xf32>
    %9 = arith.mulf %8, %5 : vector<8x128xf32>
    %10 = arith.select %7, %5, %9 : vector<8x128xi1>, vector<8x128xf32>
    %cst_7 = arith.constant dense<0.000000e+00> : vector<128xf32>
    %11 = vector.multi_reduction <add>, %10, %cst_7 [0] : vector<8x128xf32> to vector<128xf32>
    %12 = vector.shape_cast %11 : vector<128xf32> to vector<1x128xf32>
    %cst_8 = arith.constant 8.000000e+00 : f32
    %13 = vector.broadcast %cst_8 : f32 to vector<1x128xf32>
    %14 = arith.divf %12, %13 : vector<1x128xf32>
    %15 = vector.broadcast %14 : vector<1x128xf32> to vector<8x128xf32>
    %16 = arith.subf %10, %15 : vector<8x128xf32>
    %17 = arith.mulf %16, %16 : vector<8x128xf32>
    %cst_9 = arith.constant dense<0.000000e+00> : vector<128xf32>
    %18 = vector.multi_reduction <add>, %17, %cst_9 [0] : vector<8x128xf32> to vector<128xf32>
    %19 = vector.shape_cast %18 : vector<128xf32> to vector<1x128xf32>
    %cst_10 = arith.constant 8.000000e+00 : f32
    %20 = vector.broadcast %cst_10 : f32 to vector<1x128xf32>
    %21 = arith.divf %19, %20 : vector<1x128xf32>
    %22 = vector.broadcast %14 : vector<1x128xf32> to vector<8x128xf32>
    %23 = arith.subf %10, %22 : vector<8x128xf32>
    %cst_11 = arith.constant 9.99999974E-6 : f32
    %24 = vector.broadcast %cst_11 : f32 to vector<1x128xf32>
    %25 = arith.addf %21, %24 : vector<1x128xf32>
    %26 = math.rsqrt %25 : vector<1x128xf32>
    %27 = vector.broadcast %26 : vector<1x128xf32> to vector<8x128xf32>
    %28 = arith.mulf %23, %27 : vector<8x128xf32>
    %c0_12 = arith.constant 0 : index
    %c0_13 = arith.constant 0 : index
    %29 = vector.load %arg3[%c0_12, %c0_13] : memref<1x128xf32, #tpu.memory_space<vmem>>, vector<1x128xf32>
    %30 = vector.broadcast %29 : vector<1x128xf32> to vector<8x128xf32>
    %31 = arith.mulf %28, %30 : vector<8x128xf32>
    %c0_14 = arith.constant 0 : index
    %c0_15 = arith.constant 0 : index
    %32 = vector.load %arg4[%c0_14, %c0_15] : memref<1x128xf32, #tpu.memory_space<vmem>>, vector<1x128xf32>
    %33 = vector.broadcast %32 : vector<1x128xf32> to vector<8x128xf32>
    %34 = arith.addf %31, %33 : vector<8x128xf32>
    %c0_16 = arith.constant 0 : index
    %c0_17 = arith.constant 0 : index
    %35 = vector.load %arg5[%c0_16, %c0_17] : memref<128x256xf32, #tpu.memory_space<vmem>>, vector<128x256xf32>
    %cst_18 = arith.constant dense<0.000000e+00> : vector<8x256xf32>
    %36 = tpu.matmul %34, %35, %cst_18 {dimension_numbers = #tpu.dot_dimension_numbers<[1], [0], [0], [1], [0, 0, 1, 1], [], []>} : vector<8x128xf32>, vector<128x256xf32>, vector<8x256xf32> -> vector<8x256xf32>
    %c0_19 = arith.constant 0 : index
    %c0_20 = arith.constant 0 : index
    %37 = vector.load %arg6[%c0_19, %c0_20] : memref<1x256xf32, #tpu.memory_space<vmem>>, vector<1x256xf32>
    %38 = vector.broadcast %37 : vector<1x256xf32> to vector<8x256xf32>
    %39 = arith.addf %36, %38 : vector<8x256xf32>
    %cst_21 = arith.constant 0.000000e+00 : f32
    %40 = vector.broadcast %cst_21 : f32 to vector<8x256xf32>
    %41 = arith.cmpf oge, %39, %40 : vector<8x256xf32>
    %cst_22 = arith.constant 2.000000e-01 : f32
    %42 = vector.broadcast %cst_22 : f32 to vector<8x256xf32>
    %43 = arith.mulf %42, %39 : vector<8x256xf32>
    %44 = arith.select %41, %39, %43 : vector<8x256xi1>, vector<8x256xf32>
    %cst_23 = arith.constant dense<0.000000e+00> : vector<256xf32>
    %45 = vector.multi_reduction <add>, %44, %cst_23 [0] : vector<8x256xf32> to vector<256xf32>
    %46 = vector.shape_cast %45 : vector<256xf32> to vector<1x256xf32>
    %cst_24 = arith.constant 8.000000e+00 : f32
    %47 = vector.broadcast %cst_24 : f32 to vector<1x256xf32>
    %48 = arith.divf %46, %47 : vector<1x256xf32>
    %49 = vector.broadcast %48 : vector<1x256xf32> to vector<8x256xf32>
    %50 = arith.subf %44, %49 : vector<8x256xf32>
    %51 = arith.mulf %50, %50 : vector<8x256xf32>
    %cst_25 = arith.constant dense<0.000000e+00> : vector<256xf32>
    %52 = vector.multi_reduction <add>, %51, %cst_25 [0] : vector<8x256xf32> to vector<256xf32>
    %53 = vector.shape_cast %52 : vector<256xf32> to vector<1x256xf32>
    %cst_26 = arith.constant 8.000000e+00 : f32
    %54 = vector.broadcast %cst_26 : f32 to vector<1x256xf32>
    %55 = arith.divf %53, %54 : vector<1x256xf32>
    %56 = vector.broadcast %48 : vector<1x256xf32> to vector<8x256xf32>
    %57 = arith.subf %44, %56 : vector<8x256xf32>
    %cst_27 = arith.constant 9.99999974E-6 : f32
    %58 = vector.broadcast %cst_27 : f32 to vector<1x256xf32>
    %59 = arith.addf %55, %58 : vector<1x256xf32>
    %60 = math.rsqrt %59 : vector<1x256xf32>
    %61 = vector.broadcast %60 : vector<1x256xf32> to vector<8x256xf32>
    %62 = arith.mulf %57, %61 : vector<8x256xf32>
    %c0_28 = arith.constant 0 : index
    %c0_29 = arith.constant 0 : index
    %63 = vector.load %arg7[%c0_28, %c0_29] : memref<1x256xf32, #tpu.memory_space<vmem>>, vector<1x256xf32>
    %64 = vector.broadcast %63 : vector<1x256xf32> to vector<8x256xf32>
    %65 = arith.mulf %62, %64 : vector<8x256xf32>
    %c0_30 = arith.constant 0 : index
    %c0_31 = arith.constant 0 : index
    %66 = vector.load %arg8[%c0_30, %c0_31] : memref<1x256xf32, #tpu.memory_space<vmem>>, vector<1x256xf32>
    %67 = vector.broadcast %66 : vector<1x256xf32> to vector<8x256xf32>
    %68 = arith.addf %65, %67 : vector<8x256xf32>
    %c0_32 = arith.constant 0 : index
    %c0_33 = arith.constant 0 : index
    %69 = vector.load %arg9[%c0_32, %c0_33] : memref<256x1536xf32, #tpu.memory_space<vmem>>, vector<256x1536xf32>
    %cst_34 = arith.constant dense<0.000000e+00> : vector<8x1536xf32>
    %70 = tpu.matmul %68, %69, %cst_34 {dimension_numbers = #tpu.dot_dimension_numbers<[1], [0], [0], [1], [0, 0, 1, 1], [], []>} : vector<8x256xf32>, vector<256x1536xf32>, vector<8x1536xf32> -> vector<8x1536xf32>
    %c0_35 = arith.constant 0 : index
    %c0_36 = arith.constant 0 : index
    %71 = vector.load %arg10[%c0_35, %c0_36] : memref<1x1536xf32, #tpu.memory_space<vmem>>, vector<1x1536xf32>
    %72 = vector.broadcast %71 : vector<1x1536xf32> to vector<8x1536xf32>
    %73 = arith.addf %70, %72 : vector<8x1536xf32>
    %74 = vector.extract_strided_slice %73 {offsets = [0, 0], sizes = [8, 512], strides = [1, 1]} : vector<8x1536xf32> to vector<8x512xf32>
    %cst_37 = arith.constant -3.000000e+01 : f32
    %cst_38 = arith.constant 3.000000e+01 : f32
    %75 = vector.broadcast %cst_37 : f32 to vector<8x512xf32>
    %76 = arith.maximumf %75, %74 : vector<8x512xf32>
    %77 = vector.broadcast %cst_38 : f32 to vector<8x512xf32>
    %78 = arith.minimumf %77, %76 : vector<8x512xf32>
    %79 = math.exp %78 : vector<8x512xf32>
    %c0_39 = arith.constant 0 : index
    %c0_40 = arith.constant 0 : index
    %80 = vector.load %arg11[%c0_39, %c0_40] : memref<8x512xf32, #tpu.memory_space<vmem>>, vector<8x512xf32>
    tpu.vector_store %arg11[%c0_39, %c0_40], %79 {strides = array<i32>} : memref<8x512xf32, #tpu.memory_space<vmem>>, vector<8x512xf32>,
    %81 = vector.extract_strided_slice %73 {offsets = [0, 512], sizes = [8, 512], strides = [1, 1]} : vector<8x1536xf32> to vector<8x512xf32>
    %82 = arith.negf %81 : vector<8x512xf32>
    %83 = math.exp %82 : vector<8x512xf32>
    %cst_41 = arith.constant 1.000000e+00 : f32
    %84 = vector.broadcast %cst_41 : f32 to vector<8x512xf32>
    %85 = arith.addf %84, %83 : vector<8x512xf32>
    %86 = arith.divf %84, %85 : vector<8x512xf32>
    %c0_42 = arith.constant 0 : index
    %c0_43 = arith.constant 0 : index
    %87 = vector.load %arg12[%c0_42, %c0_43] : memref<8x512xf32, #tpu.memory_space<vmem>>, vector<8x512xf32>
    tpu.vector_store %arg12[%c0_42, %c0_43], %86 {strides = array<i32>} : memref<8x512xf32, #tpu.memory_space<vmem>>, vector<8x512xf32>,
    %88 = vector.extract_strided_slice %73 {offsets = [0, 1024], sizes = [8, 512], strides = [1, 1]} : vector<8x1536xf32> to vector<8x512xf32>
    %89 = arith.negf %88 : vector<8x512xf32>
    %90 = math.exp %89 : vector<8x512xf32>
    %cst_44 = arith.constant 1.000000e+00 : f32
    %91 = vector.broadcast %cst_44 : f32 to vector<8x512xf32>
    %92 = arith.addf %91, %90 : vector<8x512xf32>
    %93 = arith.divf %91, %92 : vector<8x512xf32>
    %c0_45 = arith.constant 0 : index
    %c0_46 = arith.constant 0 : index
    %94 = vector.load %arg13[%c0_45, %c0_46] : memref<8x512xf32, #tpu.memory_space<vmem>>, vector<8x512xf32>
    tpu.vector_store %arg13[%c0_45, %c0_46], %93 {strides = array<i32>} : memref<8x512xf32, #tpu.memory_space<vmem>>, vector<8x512xf32>,
    return
  }
}

</mosaic_0001>

<bundles_post_ra>
// kernel: decoder_profile_forward.3
= control target key start
LH: loop header
LB: loop body
LE: loop exit
PB: predicated region body
PF: predicated region fallthrough
CT: control target
= control target key end

     0   :  { %19 = vsyncpa [#allocation3], 0  ;;  %s2118_s0 = inlined_call_operand.hbm [shape: f32[8,64], index: 0, kind: input, shape index: {}]   ;;  %s2119_s1 = inlined_call_operand.hbm [shape: f32[64,128], index: 1, kind: input, shape index: {}]   ;;  %s2120_s2 = inlined_call_operand.hbm [shape: f32[1,128], index: 2, kind: input, shape index: {}]   ;;  %s2121_s3 = inlined_call_operand.hbm [shape: f32[1,128], index: 3, kind: input, shape index: {}]   ;;  %s2122_s4 = inlined_call_operand.hbm [shape: f32[1,128], index: 4, kind: input, shape index: {}]   ;;  %s2123_s5 = inlined_call_operand.hbm [shape: f32[128,256], index: 5, kind: input, shape index: {}]   ;;  %s2124_s6 = inlined_call_operand.hbm [shape: f32[1,256], index: 6, kind: input, shape index: {}]   ;;  %s2125_s7 = inlined_call_operand.hbm [shape: f32[1,256], index: 7, kind: input, shape index: {}]   ;;  %s2126_s8 = inlined_call_operand.hbm [shape: f32[1,256], index: 8, kind: input, shape index: {}]   ;;  %s2127_s9 = inlined_call_operand.hbm [shape: f32[256,1536], index: 9, kind: input, shape index: {}]   ;;  %s2128_s10 = inlined_call_operand.hbm [shape: f32[1,1536], index: 10, kind: input, shape index: {}]   ;;  %s2129_s11 = inlined_call_operand.vmem [shape: f32[8,512], index: 11, kind: output, shape index: {0}]   ;;  %s2130_s12 = inlined_call_operand.vmem [shape: f32[8,512], index: 12, kind: output, shape index: {1}]   ;;  %s2131_s13 = inlined_call_operand.vmem [shape: f32[8,512], index: 13, kind: output, shape index: {2}]  }
   0x1   :  { %20 = vsyncpa [#allocation5], 0 }
   0x2   :  { %21 = vsyncpa [#allocation8], 0 }
   0x3   :  { %22 = vsyncpa [#allocation11], 0 }
   0x4   :  { %23 = vsyncpa [#allocation14], 0  ;;  %s40_s27 = sshll.u32 %s2119_s1, 4  ;;  %s41_s27 = int_to_ptr.hbm [resolvable:$true] %s40_s27 }
   0x5   :  { %24 = vsyncpa [#allocation17], 0  ;;  %s1885_s28 = smov [#allocation4]   ;;  %s65_s15 = sshll.u32 %s2121_s3, 4  ;;  %s66_s15 = int_to_ptr.hbm [resolvable:$true] %s65_s15 }
   0x6   :  { %s42_s29 = sshll.u32 %s1885_s28, 4  ;;  %s1886_s16 = smov 128   ;;  %s43_s29 = int_to_ptr.vmem [resolvable:$true] %s42_s29 }
   0x7   :  { %s1887_s17 = smov 8   ;;  %s1888_s18 = smov [#allocation7]  }
   0x8   :  { %48 = dma.hbm_to_vmem [thread:$0]  %s41_s27, 1024, %s43_s29, [#allocation5], %s1886_s16, %s1886_s16, %s1887_s17  }
   0x9   :  { %s67_s19 = sshll.u32 %s1888_s18, 4  ;;  %s86_s22 = sshll.u32 %s2123_s5, 4  ;;  %s68_s19 = int_to_ptr.vmem [resolvable:$true] %s67_s19  ;;  %s87_s22 = int_to_ptr.hbm [resolvable:$true] %s86_s22 }
   0xa   :  { %70 = dma.hbm_to_vmem [thread:$0]  %s66_s15, 16, %s68_s19, [#allocation8]  }
   0xb   :  { %s1889_s1 = smov [#allocation10]   ;;  %s111_s3 = sshll.u32 %s2125_s7, 4  ;;  %s112_s3 = int_to_ptr.hbm [resolvable:$true] %s111_s3 }
   0xc   :  { %s88_s23 = sshll.u32 %s1889_s1, 4  ;;  %s1890_s26 = smov 256   ;;  %s89_s23 = int_to_ptr.vmem [resolvable:$true] %s88_s23 }
   0xd   :  { %s1891_s28 = smov 16   ;;  %s1892_s27 = smov [#allocation13]  }
   0xe   :  { %94 = dma.hbm_to_vmem [thread:$0]  %s87_s22, 4096, %s89_s23, [#allocation11], %s1890_s26, %s1890_s26, %s1891_s28  }
   0xf   :  { %s113_s29 = sshll.u32 %s1892_s27, 4  ;;  %s132_s5 = sshll.u32 %s2127_s9, 4  ;;  %s114_s29 = int_to_ptr.vmem [resolvable:$true] %s113_s29  ;;  %s133_s5 = int_to_ptr.hbm [resolvable:$true] %s132_s5 }
  0x10   :  { %116 = dma.hbm_to_vmem [thread:$0]  %s112_s3, 32, %s114_s29, [#allocation14]  }
  0x11   :  { %s1893_s15 = smov [#allocation16]   ;;  %s30_s7 = sshll.u32 %s2118_s0, 4  ;;  %s31_s7 = int_to_ptr.hbm [resolvable:$true] %s30_s7 }
  0x12   :  { %s134_s16 = sshll.u32 %s1893_s15, 4  ;;  %s1894_s19 = smov 1536   ;;  %s135_s16 = int_to_ptr.vmem [resolvable:$true] %s134_s16 }
  0x13   :  { %s1895_s20 = smov 96   ;;  %s1896_s21 = smov [#allocation2]  }
  0x14   :  { %140 = dma.hbm_to_vmem [thread:$0]  %s133_s5, 49152, %s135_s16, [#allocation17], %s1894_s19, %s1894_s19, %s1895_s20  }
  0x15   :  { %s32_s22 = sshll.u32 %s1896_s21, 4  ;;  %s54_s9 = sshll.u32 %s2120_s2, 4  ;;  %s33_s22 = int_to_ptr.vmem [resolvable:$true] %s32_s22  ;;  %s55_s9 = int_to_ptr.hbm [resolvable:$true] %s54_s9 }
  0x16   :  { %35 = dma.hbm_to_vmem [thread:$0]  %s31_s7, 128, %s33_s22, [#allocation3]  }
  0x17   :  { %s76_s3 = sshll.u32 %s2122_s4, 4  ;;  %s1897_s26 = smov [#allocation6]   ;;  %s77_s3 = int_to_ptr.hbm [resolvable:$true] %s76_s3 }
  0x18   :  { %s56_s28 = sshll.u32 %s1897_s26, 4  ;;  %s1898_s0 = smov [#allocation9]   ;;  %s57_s28 = int_to_ptr.vmem [resolvable:$true] %s56_s28 }
  0x19   :  { %59 = dma.hbm_to_vmem [thread:$0]  %s55_s9, 16, %s57_s28, [#allocation5]  }
  0x1a   :  { %s78_s27 = sshll.u32 %s1898_s0, 4  ;;  %s100_s14 = sshll.u32 %s2124_s6, 4  ;;  %s79_s27 = int_to_ptr.vmem [resolvable:$true] %s78_s27  ;;  %s101_s14 = int_to_ptr.hbm [resolvable:$true] %s100_s14 }
  0x1b   :  { %81 = dma.hbm_to_vmem [thread:$0]  %s77_s3, 16, %s79_s27, [#allocation8]  }
  0x1c   :  { %s122_s15 = sshll.u32 %s2126_s8, 4  ;;  %s1899_s16 = smov [#allocation12]   ;;  %s123_s15 = int_to_ptr.hbm [resolvable:$true] %s122_s15 }
  0x1d   :  { %s102_s4 = sshll.u32 %s1899_s16, 4  ;;  %s1900_s17 = smov [#allocation15]   ;;  %s103_s4 = int_to_ptr.vmem [resolvable:$true] %s102_s4 }
  0x1e   :  { %105 = dma.hbm_to_vmem [thread:$0]  %s101_s14, 32, %s103_s4, [#allocation11]  }
  0x1f   :  { %s124_s18 = sshll.u32 %s1900_s17, 4  ;;  %s146_s20 = sshll.u32 %s2128_s10, 4  ;;  %s125_s18 = int_to_ptr.vmem [resolvable:$true] %s124_s18  ;;  %s147_s20 = int_to_ptr.hbm [resolvable:$true] %s146_s20 }
  0x20   :  { %127 = dma.hbm_to_vmem [thread:$0]  %s123_s15, 32, %s125_s18, [#allocation14]  }
  0x21   :  { %s1901_s6 = smov [#allocation18]  }
  0x22   :  { %s148_s21 = sshll.u32 %s1901_s6, 4  ;;  %s149_s21 = int_to_ptr.vmem [resolvable:$true] %s148_s21 }
  0x23   :  { %151 = dma.hbm_to_vmem [thread:$0]  %s147_s20, 192, %s149_s21, [#allocation17]  }
  0x24   :  { %1873 = dma.done.wait [#allocation3], 128  }
  0x25   :  { %1874 = vsyncadd [#allocation3], 4294967168 }
  0x26   :  { %1875 = dma.done.wait [#allocation5], 1040  }
  0x27   :  { %1876 = vsyncadd [#allocation5], 4294966256 }
  0x28   :  { %1877 = dma.done.wait [#allocation8], 32  }
  0x29   :  { %1878 = vsyncadd [#allocation8], 4294967264 }
  0x2a   :  { %1879 = dma.done.wait [#allocation11], 4128  }
  0x2b   :  { %1880 = vsyncadd [#allocation11], 4294963168 }
  0x2c   :  { %1881 = dma.done.wait [#allocation14], 64  }
  0x2d   :  { %1882 = vsyncadd [#allocation14], 4294967232 }
  0x2e   :  { %1883 = dma.done.wait [#allocation17], 49344  }
  0x2f   :  { %1884 = vsyncadd [#allocation17], 4294917952  ;;  %v204_v0 = vld [vmem:[#allocation4 + $0x38] sm:$0xff]  ;;  %v203_v1 = vld [vmem:[#allocation4 + $0x30] sm:$0xff]  ;;  %vm209_vm0 = vcmask 523264   ;;  %v1902_v9 = vmov 8.0  }
  0x30   :  { %221 = vmatpush.msra.mxu0 %v204_v0  ;;  %v202_v2 = vld [vmem:[#allocation4 + $0x28] sm:$0xff]  ;;  %v201_v3 = vld [vmem:[#allocation4 + $0x20] sm:$0xff]  ;;  %v200_v4 = vld [vmem:[#allocation4 + $0x18] sm:$0xff]  ;;  %1561 = vrcp.f32 %v1902_v9 }
  0x31   :  { %v199_v5 = vld [vmem:[#allocation4 + $0x10] sm:$0xff]  ;;  %v198_v6 = vld [vmem:[#allocation4 + $0x8] sm:$0xff]  ;;  %v197_v7 = vld [vmem:[#allocation4] sm:$0xff] }
  0x32   :  { %222 = vmatpush.msra.mxu0 %v203_v1  ;;  %v196_v8 = vld [vmem:[#allocation2] sm:$0xff]  ;;  %v1558_v11 = vld [vmem:[#allocation6] ss:$0 sm:$0xff]  ;;  %v309_v17 = vld [vmem:[#allocation10 + $0xe0] sm:$0xff] }
  0x33   :  { %v311_v14 = vld [vmem:[#allocation10 + $0xf0] sm:$0xff]  ;;  %v312_v15 = vld [vmem:[#allocation10 + $0xf8] sm:$0xff]  ;;  %v310_v18 = vld [vmem:[#allocation10 + $0xe8] sm:$0xff] }
  0x34   :  { %223 = vmatpush.msra.mxu0 %v202_v2  ;;  %319 = vmatpush.msra.mxu1 %v311_v14  ;;  %v307_v19 = vld [vmem:[#allocation10 + $0xd0] sm:$0xff]  ;;  %v308_v22 = vld [vmem:[#allocation10 + $0xd8] sm:$0xff]  ;;  %v305_v23 = vld [vmem:[#allocation10 + $0xc0] sm:$0xff] }
  0x35   :  { %339 = vmatpush.msra.mxu2 %v312_v15  ;;  %v306_v24 = vld [vmem:[#allocation10 + $0xc8] sm:$0xff]  ;;  %v303_v27 = vld [vmem:[#allocation10 + $0xb0] sm:$0xff]  ;;  %v304_v28 = vld [vmem:[#allocation10 + $0xb8] sm:$0xff] }
  0x36   :  { %224 = vmatpush.msra.mxu0 %v201_v3  ;;  %v1562_v10 = vpop.eup %1561  ;;  %320 = vmatpush.msra.mxu1 %v309_v17  ;;  %v301_v31 = vld [vmem:[#allocation10 + $0xa0] sm:$0xff]  ;;  %v302_v32 = vld [vmem:[#allocation10 + $0xa8] sm:$0xff]  ;;  %v299_v34 = vld [vmem:[#allocation10 + $0x90] sm:$0xff] }
  0x37   :  { %v243_v12 = vmul.f32 8.0, %v1562_v10  ;;  %340 = vmatpush.msra.mxu2 %v310_v18  ;;  %v300_v35 = vld [vmem:[#allocation10 + $0x98] sm:$0xff]  ;;  %vm247_vm2 = vweird.f32 %v1562_v10  ;;  %v297_v38 = vld [vmem:[#allocation10 + $0x80] sm:$0xff]  ;;  %v298_v39 = vld [vmem:[#allocation10 + $0x88] sm:$0xff] }
  0x38   :  { %225 = vmatpush.msra.mxu0 %v200_v4  ;;  %321 = vmatpush.msra.mxu1 %v307_v19  ;;  %v295_v41 = vld [vmem:[#allocation10 + $0x70] sm:$0xff]  ;;  %v296_v42 = vld [vmem:[#allocation10 + $0x78] sm:$0xff]  ;;  %v293_v45 = vld [vmem:[#allocation10 + $0x60] sm:$0xff] }
  0x39   :  { %v244_v21 = vsub.f32 1.0, %v243_v12  ;;  %341 = vmatpush.msra.mxu2 %v308_v22  ;;  %v294_v46 = vld [vmem:[#allocation10 + $0x68] sm:$0xff]  ;;  %v291_v48 = vld [vmem:[#allocation10 + $0x50] sm:$0xff]  ;;  %v292_v49 = vld [vmem:[#allocation10 + $0x58] sm:$0xff] }
  0x3a   :  { %226 = vmatpush.msra.mxu0 %v199_v5  ;;  %322 = vmatpush.msra.mxu1 %v305_v23  ;;  %v289_v51 = vld [vmem:[#allocation10 + $0x40] sm:$0xff]  ;;  %v290_v52 = vld [vmem:[#allocation10 + $0x48] sm:$0xff]  ;;  %v287_v54 = vld [vmem:[#allocation10 + $0x30] sm:$0xff] }
  0x3b   :  { %v245_v29 = vmul.f32 %v1562_v10, %v244_v21  ;;  %342 = vmatpush.msra.mxu2 %v306_v24  ;;  %v288_v55 = vld [vmem:[#allocation10 + $0x38] sm:$0xff]  ;;  %v285_v57 = vld [vmem:[#allocation10 + $0x20] sm:$0xff]  ;;  %v286_v58 = vld [vmem:[#allocation10 + $0x28] sm:$0xff] }
  0x3c   :  { %227 = vmatpush.msra.mxu0 %v198_v6  ;;  %323 = vmatpush.msra.mxu1 %v303_v27  ;;  %v283_v60 = vld [vmem:[#allocation10 + $0x10] sm:$0xff]  ;;  %v284_v61 = vld [vmem:[#allocation10 + $0x18] sm:$0xff]  ;;  %v281_v63 = vld [vmem:[#allocation10] sm:$0xff] }
  0x3d   :  { %343 = vmatpush.msra.mxu2 %v304_v28  ;;  %v246_v36 = vadd.f32 %v1562_v10, %v245_v29  ;;  %v282_v0 = vld [vmem:[#allocation10 + $0x8] sm:$0xff]  ;;  %v1559_v12 = vld [vmem:[#allocation7] ss:$0 sm:$0xff]  ;;  %v1560_v15 = vld [vmem:[#allocation9] ss:$0 sm:$0xff] }
  0x3e   :  { %228 = vmatpush.msra.mxu0 %v197_v7  ;;  %324 = vmatpush.msra.mxu1 %v301_v31  ;;  %v617_v18 = vld [vmem:[#allocation16 + $0x5a0] sm:$0xff]  ;;  %v618_v19 = vld [vmem:[#allocation16 + $0x5a8] sm:$0xff] }
  0x3f   :  { %1527 = vmatmul.msk.f32.vlgmr.msra.gmra.mxu0 %vm209_vm0, %v196_v8  ;;  %344 = vmatpush.msra.mxu2 %v302_v32  ;;  %v2006_v43 = vsel %vm247_vm2, %v1562_v10, %v246_v36  ;;  %v606_v21 = vld [vmem:[#allocation16 + $0x548] sm:$0xff]  ;;  %v593_v22 = vld [vmem:[#allocation16 + $0x4e0] sm:$0xff] }
  0x40   :  { %325 = vmatpush.msra.mxu1 %v299_v34  ;;  %849 = vmatpush.msra.mxu3 %v617_v18  ;;  %v594_v23 = vld [vmem:[#allocation16 + $0x4e8] sm:$0xff]  ;;  %v581_v24 = vld [vmem:[#allocation16 + $0x480] sm:$0xff] }
  0x41   :  { %345 = vmatpush.msra.mxu2 %v300_v35  ;;  %v810_v27 = vld [vmem:[#allocation16 + $0xba8] sm:$0xff]  ;;  %v569_v28 = vld [vmem:[#allocation16 + $0x420] sm:$0xff] }
  0x42   :  { %326 = vmatpush.msra.mxu1 %v297_v38  ;;  %v797_v29 = vld [vmem:[#allocation16 + $0xb40] sm:$0xff]  ;;  %v798_v31 = vld [vmem:[#allocation16 + $0xb48] sm:$0xff] }
  0x43   :  { %346 = vmatpush.msra.mxu2 %v298_v39  ;;  %v557_v32 = vld [vmem:[#allocation16 + $0x3c0] sm:$0xff]  ;;  %v558_v34 = vld [vmem:[#allocation16 + $0x3c8] sm:$0xff] }
  0x44   :  { %327 = vmatpush.msra.mxu1 %v295_v41  ;;  %v786_v35 = vld [vmem:[#allocation16 + $0xae8] sm:$0xff]  ;;  %v545_v36 = vld [vmem:[#allocation16 + $0x360] sm:$0xff] }
  0x45   :  { %347 = vmatpush.msra.mxu2 %v296_v42  ;;  %v546_v38 = vld [vmem:[#allocation16 + $0x368] sm:$0xff]  ;;  %v761_v41 = vld [vmem:[#allocation16 + $0xa20] sm:$0xff] }
  0x46   :  { %328 = vmatpush.msra.mxu1 %v293_v45  ;;  %v774_v39 = vld [vmem:[#allocation16 + $0xa88] sm:$0xff]  ;;  %v521_v45 = vld [vmem:[#allocation16 + $0x2a0] sm:$0xff] }
  0x47   :  { %348 = vmatpush.msra.mxu2 %v294_v46  ;;  %v534_v42 = vld [vmem:[#allocation16 + $0x308] sm:$0xff]  ;;  %v749_v46 = vld [vmem:[#allocation16 + $0x9c0] sm:$0xff] }
  0x48   :  { %329 = vmatpush.msra.mxu1 %v291_v48  ;;  %v750_v48 = vld [vmem:[#allocation16 + $0x9c8] sm:$0xff] }
  0x49   :  { %349 = vmatpush.msra.mxu2 %v292_v49  ;;  %v509_v49 = vld [vmem:[#allocation16 + $0x240] sm:$0xff] }
  0x4a   :  { %330 = vmatpush.msra.mxu1 %v289_v51  ;;  %v510_v51 = vld [vmem:[#allocation16 + $0x248] sm:$0xff] }
  0x4b   :  { %350 = vmatpush.msra.mxu2 %v290_v52  ;;  %v738_v52 = vld [vmem:[#allocation16 + $0x968] sm:$0xff] }
  0x4c   :  { %331 = vmatpush.msra.mxu1 %v287_v54  ;;  %v725_v54 = vld [vmem:[#allocation16 + $0x900] sm:$0xff] }
  0x4d   :  { %351 = vmatpush.msra.mxu2 %v288_v55  ;;  %v498_v55 = vld [vmem:[#allocation16 + $0x1e8] sm:$0xff] }
  0x4e   :  { %332 = vmatpush.msra.mxu1 %v285_v57  ;;  %v485_v57 = vld [vmem:[#allocation16 + $0x180] sm:$0xff] }
  0x4f   :  { %352 = vmatpush.msra.mxu2 %v286_v58  ;;  %v713_v58 = vld [vmem:[#allocation16 + $0x8a0] sm:$0xff] }
  0x50   :  { %333 = vmatpush.msra.mxu1 %v283_v60  ;;  %v714_v60 = vld [vmem:[#allocation16 + $0x8a8] sm:$0xff] }
  0x51   :  { %353 = vmatpush.msra.mxu2 %v284_v61  ;;  %v473_v61 = vld [vmem:[#allocation16 + $0x120] sm:$0xff] }
  0x52   :  { %334 = vmatpush.msra.mxu1 %v281_v63  ;;  %v474_v63 = vld [vmem:[#allocation16 + $0x128] sm:$0xff] }
  0x53   :  { %354 = vmatpush.msra.mxu2 %v282_v0  ;;  %v2010_v0 = vld [vmem:[#allocation12] sm:$0x3] }
  0x54   :  { %889 = vmatpush.msrb.mxu1 %v618_v19  ;;  %v653_v19 = vld [vmem:[#allocation16 + $0x6c0] sm:$0xff] }
  0x55   :  { %909 = vmatpush.msrb.mxu2 %v810_v27  ;;  %v595_v27 = vld [vmem:[#allocation16 + $0x4f0] sm:$0xff] }
  0x56   :  { %890 = vmatpush.msrb.mxu1 %v606_v21  ;;  %v607_v21 = vld [vmem:[#allocation16 + $0x550] sm:$0xff] }
  0x57   :  { %910 = vmatpush.msrb.mxu2 %v798_v31  ;;  %v630_v31 = vld [vmem:[#allocation16 + $0x608] sm:$0xff] }
  0x58   :  { %891 = vmatpush.msrb.mxu1 %v594_v23 }
  0x59   :  { %911 = vmatpush.msrb.mxu2 %v786_v35  ;;  %v811_v35 = vld [vmem:[#allocation16 + $0xbb0] sm:$0xff] }
  0x5b   :  { %912 = vmatpush.msrb.mxu2 %v774_v39 }
  0xbc   :  { %v230_v13 = vpop.f32.mrf.mxu0 }
  0xbd   :  { %v231_v16 = vadd.f32 %v1558_v11, %v230_v13 }
  0xbf   :  { %vm233_vm1 = vcmp.ge.f32.partialorder %v231_v16, 0.0  ;;  %v234_v20 = vmul.f32 0.2, %v231_v16 }
  0xc1   :  { %v235_v25 = vsel %vm233_vm1, %v231_v16, %v234_v20  ;;  %v605_v20 = vld [vmem:[#allocation16 + $0x540] sm:$0xff] }
  0xc2   :  { %v236_v26 = vrot.slane %v235_v25, 4  ;;  %850 = vmatpush.msra.mxu3 %v605_v20  ;;  %v654_v20 = vld [vmem:[#allocation16 + $0x6c8] sm:$0xff] }
  0xc4   :  { %v237_v30 = vadd.f32 %v236_v26, %v235_v25  ;;  %851 = vmatpush.msra.mxu3 %v593_v22  ;;  %v582_v26 = vld [vmem:[#allocation16 + $0x488] sm:$0xff]  ;;  %v608_v22 = vld [vmem:[#allocation16 + $0x558] sm:$0xff] }
  0xc5   :  { %892 = vmatpush.msrb.mxu1 %v582_v26  ;;  %v642_v26 = vld [vmem:[#allocation16 + $0x668] sm:$0xff] }
  0xc6   :  { %v238_v33 = vrot.slane %v237_v30, 2  ;;  %852 = vmatpush.msra.mxu3 %v581_v24  ;;  %v316_v24 = vperm.slane %v2010_v0, 1 }
  0xc8   :  { %v239_v37 = vadd.f32 %v238_v33, %v237_v30  ;;  %v570_v30 = vld [vmem:[#allocation16 + $0x428] sm:$0xff]  ;;  %853 = vmatpush.msra.mxu3 %v569_v28  ;;  %v785_v33 = vld [vmem:[#allocation16 + $0xae0] sm:$0xff]  ;;  %v596_v28 = vld [vmem:[#allocation16 + $0x4f8] sm:$0xff] }
  0xc9   :  { %893 = vmatpush.msrb.mxu1 %v570_v30  ;;  %v629_v30 = vld [vmem:[#allocation16 + $0x600] sm:$0xff] }
  0xca   :  { %v240_v40 = vrot.slane %v239_v37, 1  ;;  %854 = vmatpush.msra.mxu3 %v557_v32 }
  0xcb   :  { %894 = vmatpush.msrb.mxu1 %v558_v34  ;;  %v583_v34 = vld [vmem:[#allocation16 + $0x490] sm:$0xff] }
  0xcc   :  { %v241_v44 = vadd.f32 %v240_v40, %v239_v37  ;;  %v773_v37 = vld [vmem:[#allocation16 + $0xa80] sm:$0xff]  ;;  %855 = vmatpush.msra.mxu3 %v545_v36  ;;  %v584_v36 = vld [vmem:[#allocation16 + $0x498] sm:$0xff] }
  0xcd   :  { %895 = vmatpush.msrb.mxu1 %v546_v38  ;;  %v533_v40 = vld [vmem:[#allocation16 + $0x300] sm:$0xff]  ;;  %v812_v38 = vld [vmem:[#allocation16 + $0xbb8] sm:$0xff] }
  0xce   :  { %v249_v47 = vmul.f32 %v2006_v43, %v241_v44  ;;  %856 = vmatpush.msra.mxu3 %v533_v40  ;;  %v762_v44 = vld [vmem:[#allocation16 + $0xa28] sm:$0xff]  ;;  %v571_v40 = vld [vmem:[#allocation16 + $0x430] sm:$0xff] }
  0xcf   :  { %896 = vmatpush.msrb.mxu1 %v534_v42  ;;  %913 = vmatpush.msrb.mxu2 %v762_v44  ;;  %v572_v42 = vld [vmem:[#allocation16 + $0x438] sm:$0xff] }
  0xd0   :  { %v250_v50 = vsub.f32 %v235_v25, %v249_v47  ;;  %v809_v25 = vld [vmem:[#allocation16 + $0xba0] sm:$0xff]  ;;  %v522_v47 = vld [vmem:[#allocation16 + $0x2a8] sm:$0xff]  ;;  %857 = vmatpush.msra.mxu3 %v521_v45  ;;  %v800_v45 = vld [vmem:[#allocation16 + $0xb58] sm:$0xff] }
  0xd1   :  { %869 = vmatpush.msrb.mxu0 %v809_v25  ;;  %897 = vmatpush.msrb.mxu1 %v522_v47  ;;  %v641_v25 = vld [vmem:[#allocation16 + $0x660] sm:$0xff]  ;;  %v559_v47 = vld [vmem:[#allocation16 + $0x3d0] sm:$0xff] }
  0xd2   :  { %v251_v53 = vmul.f32 %v250_v50, %v250_v50  ;;  %914 = vmatpush.msrb.mxu2 %v750_v48  ;;  %858 = vmatpush.msra.mxu3 %v509_v49  ;;  %v787_v48 = vld [vmem:[#allocation16 + $0xaf0] sm:$0xff]  ;;  %v560_v49 = vld [vmem:[#allocation16 + $0x3d8] sm:$0xff] }
  0xd3   :  { %870 = vmatpush.msrb.mxu0 %v797_v29  ;;  %898 = vmatpush.msrb.mxu1 %v510_v51  ;;  %v788_v51 = vld [vmem:[#allocation16 + $0xaf8] sm:$0xff] }
  0xd4   :  { %v252_v56 = vrot.slane %v251_v53, 4  ;;  %915 = vmatpush.msrb.mxu2 %v738_v52 }
  0xd5   :  { %871 = vmatpush.msrb.mxu0 %v785_v33  ;;  %899 = vmatpush.msrb.mxu1 %v498_v55  ;;  %v775_v55 = vld [vmem:[#allocation16 + $0xa90] sm:$0xff] }
  0xd6   :  { %v253_v59 = vadd.f32 %v252_v56, %v251_v53  ;;  %v497_v53 = vld [vmem:[#allocation16 + $0x1e0] sm:$0xff]  ;;  %v726_v56 = vld [vmem:[#allocation16 + $0x908] sm:$0xff] }
  0xd7   :  { %872 = vmatpush.msrb.mxu0 %v773_v37  ;;  %859 = vmatpush.msra.mxu3 %v497_v53 }
  0xd8   :  { %v254_v62 = vrot.slane %v253_v59, 2  ;;  %916 = vmatpush.msrb.mxu2 %v726_v56  ;;  %v548_v56 = vld [vmem:[#allocation16 + $0x378] sm:$0xff] }
  0xd9   :  { %873 = vmatpush.msrb.mxu0 %v761_v41  ;;  %860 = vmatpush.msra.mxu3 %v485_v57  ;;  %v799_v41 = vld [vmem:[#allocation16 + $0xb50] sm:$0xff]  ;;  %v776_v57 = vld [vmem:[#allocation16 + $0xa98] sm:$0xff] }
  0xda   :  { %v255_v1 = vadd.f32 %v254_v62, %v253_v59  ;;  %v486_v59 = vld [vmem:[#allocation16 + $0x188] sm:$0xff]  ;;  %917 = vmatpush.msrb.mxu2 %v714_v60  ;;  %v701_v62 = vld [vmem:[#allocation16 + $0x840] sm:$0xff]  ;;  %v535_v60 = vld [vmem:[#allocation16 + $0x310] sm:$0xff] }
  0xdb   :  { %874 = vmatpush.msrb.mxu0 %v749_v46  ;;  %900 = vmatpush.msrb.mxu1 %v486_v59 }
  0xdc   :  { %v256_v2 = vrot.slane %v255_v1, 1  ;;  %861 = vmatpush.msra.mxu3 %v473_v61  ;;  %v763_v61 = vld [vmem:[#allocation16 + $0xa30] sm:$0xff] }
  0xdd   :  { %901 = vmatpush.msrb.mxu1 %v474_v63  ;;  %v764_v63 = vld [vmem:[#allocation16 + $0xa38] sm:$0xff] }
  0xde   :  { %v257_v3 = vadd.f32 %v256_v2, %v255_v1  ;;  %v702_v1 = vld [vmem:[#allocation16 + $0x848] sm:$0xff]  ;;  %v461_v2 = vld [vmem:[#allocation16 + $0xc0] sm:$0xff] }
  0xdf   :  { %918 = vmatpush.msrb.mxu2 %v702_v1  ;;  %862 = vmatpush.msra.mxu3 %v461_v2  ;;  %v523_v2 = vld [vmem:[#allocation16 + $0x2b0] sm:$0xff] }
  0xe0   :  { %v258_v4 = vmul.f32 %v257_v3, %v2006_v43  ;;  %v689_v3 = vld [vmem:[#allocation16 + $0x7e0] sm:$0xff] }
  0xe2   :  { %v259_v5 = vadd.f32 1e-05, %v258_v4  ;;  %v462_v4 = vld [vmem:[#allocation16 + $0xc8] sm:$0xff] }
  0xe3   :  { %902 = vmatpush.msrb.mxu1 %v462_v4  ;;  %v524_v4 = vld [vmem:[#allocation16 + $0x2b8] sm:$0xff] }
  0xe4   :  { %1563 = vrsqrt.f32 %v259_v5  ;;  %vm266_vm4 = vweird.f32 %v259_v5 }
  0xea   :  { %v1564_v6 = vpop.eup %1563 }
  0xeb   :  { %v261_v7 = vmul.f32 %v1564_v6, %v259_v5  ;;  %vm267_vm3 = vweird.f32 %v1564_v6  ;;  %v690_v5 = vld [vmem:[#allocation16 + $0x7e8] sm:$0xff] }
  0xec   :  { %vm268_vm5 = vmor %vm266_vm4, %vm267_vm3  ;;  %919 = vmatpush.msrb.mxu2 %v690_v5  ;;  %v752_v5 = vld [vmem:[#allocation16 + $0x9d8] sm:$0xff] }
  0xed   :  { %v262_v8 = vmul.f32 %v1564_v6, %v261_v7  ;;  %v449_v7 = vld [vmem:[#allocation16 + $0x60] sm:$0xff] }
  0xee   :  { %863 = vmatpush.msra.mxu3 %v449_v7 }
  0xef   :  { %v263_v9 = vmul.f32 0.5, %v262_v8  ;;  %v677_v8 = vld [vmem:[#allocation16 + $0x780] sm:$0xff] }
  0xf1   :  { %v264_v10 = vsub.f32 1.5, %v263_v9  ;;  %v450_v9 = vld [vmem:[#allocation16 + $0x68] sm:$0xff] }
  0xf2   :  { %903 = vmatpush.msrb.mxu1 %v450_v9  ;;  %v739_v9 = vld [vmem:[#allocation16 + $0x970] sm:$0xff] }
  0xf3   :  { %v265_v11 = vmul.f32 %v1564_v6, %v264_v10  ;;  %v678_v10 = vld [vmem:[#allocation16 + $0x788] sm:$0xff] }
  0xf4   :  { %920 = vmatpush.msrb.mxu2 %v678_v10  ;;  %v512_v10 = vld [vmem:[#allocation16 + $0x258] sm:$0xff] }
  0xf5   :  { %v269_v13 = vsel %vm268_vm5, %v1564_v6, %v265_v11  ;;  %v315_v6 = vperm.slane %v2010_v0, 0  ;;  %v437_v11 = vld [vmem:[#allocation16] sm:$0xff] }
  0xf6   :  { %v270_v14 = vmul.f32 %v269_v13, %v250_v50  ;;  %v737_v50 = vld [vmem:[#allocation16 + $0x960] sm:$0xff]  ;;  %v438_v13 = vld [vmem:[#allocation16 + $0x8] sm:$0xff]  ;;  %864 = vmatpush.msra.mxu3 %v437_v11  ;;  %v740_v11 = vld [vmem:[#allocation16 + $0x978] sm:$0xff] }
  0xf7   :  { %875 = vmatpush.msrb.mxu0 %v737_v50  ;;  %904 = vmatpush.msrb.mxu1 %v438_v13 }
  0xf8   :  { %v275_v16 = vmul.f32 %v1559_v12, %v270_v14  ;;  %v665_v12 = vld [vmem:[#allocation16 + $0x720] sm:$0xff] }
  0xf9   :  { %876 = vmatpush.msrb.mxu0 %v725_v54  ;;  %v547_v54 = vld [vmem:[#allocation16 + $0x370] sm:$0xff] }
  0xfa   :  { %v280_v17 = vadd.f32 %v1560_v15, %v275_v16  ;;  %v666_v15 = vld [vmem:[#allocation16 + $0x728] sm:$0xff]  ;;  %v619_v16 = vld [vmem:[#allocation16 + $0x5b0] sm:$0xff] }
  0xfb   :  { %877 = vmatpush.msrb.mxu0 %v713_v58  ;;  %921 = vmatpush.msrb.mxu2 %v666_v15  ;;  %v727_v15 = vld [vmem:[#allocation16 + $0x910] sm:$0xff] }
  0xfc   :  { %335 = vmatmul.f32.vlgmr.msra.gmra.mxu1 %v280_v17  ;;  %355 = vmatmul.f32.vlgmr.msra.gmra.mxu2 %v280_v17  ;;  %v620_v17 = vld [vmem:[#allocation16 + $0x5b8] sm:$0xff] }
  0xfd   :  { %878 = vmatpush.msrb.mxu0 %v701_v62  ;;  %929 = vmatpush.msrb.mxu3 %v619_v16  ;;  %v536_v62 = vld [vmem:[#allocation16 + $0x318] sm:$0xff] }
  0xfe   :  { %969 = vmatpush.msra.mxu1 %v620_v17  ;;  %922 = vmatpush.msrb.mxu2 %v654_v20  ;;  %v500_v16 = vld [vmem:[#allocation16 + $0x1f8] sm:$0xff]  ;;  %v487_v20 = vld [vmem:[#allocation16 + $0x190] sm:$0xff] }
  0xff   :  { %879 = vmatpush.msrb.mxu0 %v689_v3  ;;  %930 = vmatpush.msrb.mxu3 %v607_v21  ;;  %v751_v3 = vld [vmem:[#allocation16 + $0x9d0] sm:$0xff]  ;;  %v728_v17 = vld [vmem:[#allocation16 + $0x918] sm:$0xff] }
 0x100   :  { %970 = vmatpush.msra.mxu1 %v608_v22  ;;  %923 = vmatpush.msrb.mxu2 %v642_v26  ;;  %v715_v21 = vld [vmem:[#allocation16 + $0x8b0] sm:$0xff]  ;;  %v488_v22 = vld [vmem:[#allocation16 + $0x198] sm:$0xff] }
 0x101   :  { %880 = vmatpush.msrb.mxu0 %v677_v8  ;;  %931 = vmatpush.msrb.mxu3 %v595_v27  ;;  %v511_v8 = vld [vmem:[#allocation16 + $0x250] sm:$0xff] }
 0x102   :  { %971 = vmatpush.msra.mxu1 %v596_v28  ;;  %924 = vmatpush.msrb.mxu2 %v630_v31  ;;  %v475_v26 = vld [vmem:[#allocation16 + $0x130] sm:$0xff]  ;;  %v476_v28 = vld [vmem:[#allocation16 + $0x138] sm:$0xff] }
 0x103   :  { %881 = vmatpush.msrb.mxu0 %v665_v12  ;;  %932 = vmatpush.msrb.mxu3 %v583_v34  ;;  %v703_v27 = vld [vmem:[#allocation16 + $0x850] sm:$0xff]  ;;  %v464_v34 = vld [vmem:[#allocation16 + $0xd8] sm:$0xff] }
 0x104   :  { %972 = vmatpush.msra.mxu1 %v584_v36  ;;  %989 = vmatpush.msra.mxu2 %v812_v38  ;;  %v451_v38 = vld [vmem:[#allocation16 + $0x70] sm:$0xff] }
 0x105   :  { %882 = vmatpush.msrb.mxu0 %v653_v19  ;;  %933 = vmatpush.msrb.mxu3 %v571_v40  ;;  %v452_v40 = vld [vmem:[#allocation16 + $0x78] sm:$0xff] }
 0x106   :  { %973 = vmatpush.msra.mxu1 %v572_v42  ;;  %990 = vmatpush.msra.mxu2 %v800_v45  ;;  %v439_v45 = vld [vmem:[#allocation16 + $0x10] sm:$0xff] }
 0x107   :  { %883 = vmatpush.msrb.mxu0 %v641_v25  ;;  %934 = vmatpush.msrb.mxu3 %v559_v47  ;;  %v440_v47 = vld [vmem:[#allocation16 + $0x18] sm:$0xff] }
 0x108   :  { %974 = vmatpush.msra.mxu1 %v560_v49  ;;  %991 = vmatpush.msra.mxu2 %v788_v51  ;;  %v655_v51 = vld [vmem:[#allocation16 + $0x6d0] sm:$0xff] }
 0x109   :  { %884 = vmatpush.msrb.mxu0 %v629_v30  ;;  %935 = vmatpush.msrb.mxu3 %v547_v54 }
 0x10a   :  { %975 = vmatpush.msra.mxu1 %v548_v56  ;;  %992 = vmatpush.msra.mxu2 %v776_v57  ;;  %v644_v56 = vld [vmem:[#allocation16 + $0x678] sm:$0xff] }
 0x10b   :  { %949 = vmatpush.msra.mxu0 %v811_v35  ;;  %936 = vmatpush.msrb.mxu3 %v535_v60  ;;  %v692_v35 = vld [vmem:[#allocation16 + $0x7f8] sm:$0xff] }
 0x10c   :  { %976 = vmatpush.msra.mxu1 %v536_v62  ;;  %993 = vmatpush.msra.mxu2 %v764_v63  ;;  %v632_v60 = vld [vmem:[#allocation16 + $0x618] sm:$0xff] }
 0x10d   :  { %950 = vmatpush.msra.mxu0 %v799_v41  ;;  %937 = vmatpush.msrb.mxu3 %v523_v2  ;;  %v680_v41 = vld [vmem:[#allocation16 + $0x798] sm:$0xff] }
 0x10e   :  { %977 = vmatpush.msra.mxu1 %v524_v4  ;;  %994 = vmatpush.msra.mxu2 %v752_v5 }
 0x10f   :  { %951 = vmatpush.msra.mxu0 %v787_v48  ;;  %938 = vmatpush.msrb.mxu3 %v511_v8  ;;  %v668_v48 = vld [vmem:[#allocation16 + $0x738] sm:$0xff] }
 0x110   :  { %978 = vmatpush.msra.mxu1 %v512_v10  ;;  %995 = vmatpush.msra.mxu2 %v740_v11  ;;  %v421_v8 = vld [vmem:[#allocation13] sm:$0x3]  ;;  %v429_v11 = vld [vmem:[#allocation15] sm:$0x3] }
 0x111   :  { %952 = vmatpush.msra.mxu0 %v775_v55  ;;  %v643_v55 = vld [vmem:[#allocation16 + $0x670] sm:$0xff] }
 0x112   :  { %979 = vmatpush.msra.mxu1 %v500_v16  ;;  %996 = vmatpush.msra.mxu2 %v728_v17  ;;  %v431_v17 = vperm.slane %v429_v11, 0 }
 0x113   :  { %953 = vmatpush.msra.mxu0 %v763_v61 }
 0x114   :  { %980 = vmatpush.msra.mxu1 %v488_v22  ;;  %v424_v22 = vperm.slane %v421_v8, 1 }
 0x115   :  { %954 = vmatpush.msra.mxu0 %v751_v3 }
 0x116   :  { %981 = vmatpush.msra.mxu1 %v476_v28  ;;  %v610_v28 = vld [vmem:[#allocation16 + $0x568] sm:$0xff] }
 0x117   :  { %955 = vmatpush.msra.mxu0 %v739_v9 }
 0x118   :  { %982 = vmatpush.msra.mxu1 %v464_v34  ;;  %v585_v34 = vld [vmem:[#allocation16 + $0x4a0] sm:$0xff] }
 0x119   :  { %956 = vmatpush.msra.mxu0 %v727_v15 }
 0x11a   :  { %983 = vmatpush.msra.mxu1 %v452_v40  ;;  %v802_v40 = vld [vmem:[#allocation16 + $0xb68] sm:$0xff] }
 0x11b   :  { %957 = vmatpush.msra.mxu0 %v715_v21 }
 0x11c   :  { %984 = vmatpush.msra.mxu1 %v440_v47  ;;  %v777_v47 = vld [vmem:[#allocation16 + $0xaa0] sm:$0xff] }
 0x11d   :  { %958 = vmatpush.msra.mxu0 %v703_v27  ;;  %v432_v27 = vperm.slane %v429_v11, 1  ;;  %v693_v11 = vld [vmem:[#allocation16 + $0x800] sm:$0xff] }
 0x179   :  { %v336_v14 = vpop.f32.mrf.mxu1 }
 0x17a   :  { %v337_v18 = vadd.f32 %v336_v14, %v315_v6  ;;  %v499_v14 = vld [vmem:[#allocation16 + $0x1f0] sm:$0xff] }
 0x17b   :  { %939 = vmatpush.msrb.mxu3 %v499_v14  ;;  %v423_v14 = vperm.slane %v421_v8, 0  ;;  %v478_v8 = vld [vmem:[#allocation16 + $0x148] sm:$0xff] }
 0x17c   :  { %vm359_vm6 = vcmp.ge.f32.partialorder %v337_v18, 0.0  ;;  %v361_v23 = vmul.f32 0.2, %v337_v18 }
 0x17d   :  { %940 = vmatpush.msrb.mxu3 %v487_v20 }
 0x17e   :  { %v2014_v29 = vsel %vm359_vm6, %v337_v18, %v361_v23  ;;  %v716_v23 = vld [vmem:[#allocation16 + $0x8b8] sm:$0xff] }
 0x17f   :  { %v365_v32 = vrot.slane %v2014_v29, 4  ;;  %v356_v33 = vpop.f32.mrf.mxu2  ;;  %997 = vmatpush.msra.mxu2 %v716_v23  ;;  %941 = vmatpush.msrb.mxu3 %v475_v26  ;;  %v621_v23 = vld [vmem:[#allocation16 + $0x5c0] sm:$0xff] }
 0x180   :  { %v357_v37 = vadd.f32 %v356_v33, %v316_v24  ;;  %v691_v33 = vld [vmem:[#allocation16 + $0x7f0] sm:$0xff] }
 0x181   :  { %v366_v39 = vadd.f32 %v365_v32, %v2014_v29  ;;  %v463_v32 = vld [vmem:[#allocation16 + $0xd0] sm:$0xff]  ;;  %959 = vmatpush.msra.mxu0 %v691_v33 }
 0x182   :  { %vm360_vm7 = vcmp.ge.f32.partialorder %v357_v37, 0.0  ;;  %v362_v44 = vmul.f32 0.2, %v357_v37  ;;  %942 = vmatpush.msrb.mxu3 %v463_v32  ;;  %v598_v32 = vld [vmem:[#allocation16 + $0x508] sm:$0xff] }
 0x183   :  { %v367_v46 = vrot.slane %v366_v39, 2 }
 0x184   :  { %v2018_v50 = vsel %vm360_vm7, %v357_v37, %v362_v44  ;;  %943 = vmatpush.msrb.mxu3 %v451_v38  ;;  %v801_v38 = vld [vmem:[#allocation16 + $0xb60] sm:$0xff] }
 0x185   :  { %v368_v52 = vadd.f32 %v367_v46, %v366_v39  ;;  %v371_v53 = vrot.slane %v2018_v50, 4  ;;  %v679_v39 = vld [vmem:[#allocation16 + $0x790] sm:$0xff] }
 0x186   :  { %960 = vmatpush.msra.mxu0 %v679_v39  ;;  %v667_v46 = vld [vmem:[#allocation16 + $0x730] sm:$0xff]  ;;  %944 = vmatpush.msrb.mxu3 %v439_v45  ;;  %v574_v39 = vld [vmem:[#allocation16 + $0x448] sm:$0xff] }
 0x187   :  { %v369_v58 = vrot.slane %v368_v52, 1  ;;  %v372_v59 = vadd.f32 %v371_v53, %v2018_v50  ;;  %v790_v45 = vld [vmem:[#allocation16 + $0xb08] sm:$0xff] }
 0x188   :  { %961 = vmatpush.msra.mxu0 %v667_v46  ;;  %v549_v46 = vld [vmem:[#allocation16 + $0x380] sm:$0xff] }
 0x189   :  { %v370_v0 = vadd.f32 %v369_v58, %v368_v52  ;;  %v373_v1 = vrot.slane %v372_v59, 2  ;;  %v656_v52 = vld [vmem:[#allocation16 + $0x6d8] sm:$0xff] }
 0x18a   :  { %962 = vmatpush.msra.mxu0 %v655_v51  ;;  %v765_v51 = vld [vmem:[#allocation16 + $0xa40] sm:$0xff] }
 0x18b   :  { %v377_v6 = vmul.f32 %v370_v0, %v2006_v43  ;;  %v374_v7 = vadd.f32 %v373_v1, %v372_v59  ;;  %v631_v59 = vld [vmem:[#allocation16 + $0x610] sm:$0xff] }
 0x18c   :  { %963 = vmatpush.msra.mxu0 %v643_v55  ;;  %v753_v55 = vld [vmem:[#allocation16 + $0x9e0] sm:$0xff] }
 0x18d   :  { %v2024_v12 = vsub.f32 %v2014_v29, %v377_v6  ;;  %v375_v13 = vrot.slane %v374_v7, 1  ;;  %v704_v29 = vld [vmem:[#allocation16 + $0x858] sm:$0xff] }
 0x18e   :  { %998 = vmatpush.msra.mxu2 %v704_v29  ;;  %964 = vmatpush.msra.mxu0 %v631_v59  ;;  %v741_v59 = vld [vmem:[#allocation16 + $0x980] sm:$0xff] }
 0x18f   :  { %v381_v18 = vmul.f32 %v2024_v12, %v2024_v12  ;;  %v376_v19 = vadd.f32 %v375_v13, %v374_v7 }
 0x190   :  { %999 = vmatpush.msra.mxu2 %v692_v35  ;;  %v813_v35 = vld [vmem:[#allocation16 + $0xbc0] sm:$0xff] }
 0x191   :  { %v383_v24 = vrot.slane %v381_v18, 4  ;;  %v378_v25 = vmul.f32 %v376_v19, %v2006_v43 }
 0x192   :  { %1000 = vmatpush.msra.mxu2 %v680_v41  ;;  %v561_v41 = vld [vmem:[#allocation16 + $0x3e0] sm:$0xff] }
 0x193   :  { %v384_v30 = vadd.f32 %v383_v24, %v381_v18  ;;  %v2030_v31 = vsub.f32 %v2018_v50, %v378_v25  ;;  %v622_v24 = vld [vmem:[#allocation16 + $0x5c8] sm:$0xff] }
 0x194   :  { %1001 = vmatpush.msra.mxu2 %v668_v48  ;;  %v550_v48 = vld [vmem:[#allocation16 + $0x388] sm:$0xff] }
 0x195   :  { %v385_v36 = vrot.slane %v384_v30, 2  ;;  %v382_v37 = vmul.f32 %v2030_v31, %v2030_v31 }
 0x196   :  { %1002 = vmatpush.msra.mxu2 %v656_v52  ;;  %v538_v52 = vld [vmem:[#allocation16 + $0x328] sm:$0xff] }
 0x197   :  { %v386_v42 = vadd.f32 %v385_v36, %v384_v30  ;;  %v389_v44 = vrot.slane %v382_v37, 4  ;;  %v597_v30 = vld [vmem:[#allocation16 + $0x500] sm:$0xff]  ;;  %v814_v36 = vld [vmem:[#allocation16 + $0xbc8] sm:$0xff] }
 0x198   :  { %1003 = vmatpush.msra.mxu2 %v644_v56  ;;  %v526_v56 = vld [vmem:[#allocation16 + $0x2c8] sm:$0xff] }
 0x199   :  { %v387_v49 = vrot.slane %v386_v42, 1  ;;  %v390_v50 = vadd.f32 %v389_v44, %v382_v37  ;;  %v573_v37 = vld [vmem:[#allocation16 + $0x440] sm:$0xff]  ;;  %v562_v44 = vld [vmem:[#allocation16 + $0x3e8] sm:$0xff] }
 0x19a   :  { %1004 = vmatpush.msra.mxu2 %v632_v60  ;;  %v514_v60 = vld [vmem:[#allocation16 + $0x268] sm:$0xff] }
 0x19b   :  { %v388_v53 = vadd.f32 %v387_v49, %v386_v42  ;;  %v391_v54 = vrot.slane %v390_v50, 2  ;;  %v789_v42 = vld [vmem:[#allocation16 + $0xb00] sm:$0xff]  ;;  %v778_v49 = vld [vmem:[#allocation16 + $0xaa8] sm:$0xff] }
 0x19d   :  { %v395_v57 = vmul.f32 %v388_v53, %v2006_v43  ;;  %v392_v58 = vadd.f32 %v391_v54, %v390_v50  ;;  %v537_v50 = vld [vmem:[#allocation16 + $0x320] sm:$0xff]  ;;  %v766_v53 = vld [vmem:[#allocation16 + $0xa48] sm:$0xff] }
 0x19e   :  { %v525_v54 = vld [vmem:[#allocation16 + $0x2c0] sm:$0xff] }
 0x19f   :  { %v397_v61 = vadd.f32 1e-05, %v395_v57  ;;  %v393_v62 = vrot.slane %v392_v58, 1  ;;  %v754_v57 = vld [vmem:[#allocation16 + $0x9e8] sm:$0xff] }
 0x1a1   :  { %1565 = vrsqrt.f32 %v397_v61  ;;  %v394_v63 = vadd.f32 %v393_v62, %v392_v58  ;;  %vm405_vm9 = vweird.f32 %v397_v61  ;;  %v513_v58 = vld [vmem:[#allocation16 + $0x260] sm:$0xff] }
 0x1a2   :  { %v501_v62 = vld [vmem:[#allocation16 + $0x200] sm:$0xff] }
 0x1a3   :  { %v396_v0 = vmul.f32 %v394_v63, %v2006_v43  ;;  %v729_v63 = vld [vmem:[#allocation16 + $0x920] sm:$0xff] }
 0x1a5   :  { %v398_v1 = vadd.f32 1e-05, %v396_v0  ;;  %v502_v0 = vld [vmem:[#allocation16 + $0x208] sm:$0xff] }
 0x1a7   :  { %v1566_v2 = vpop.eup %1565  ;;  %1567 = vrsqrt.f32 %v398_v1  ;;  %vm415_vm12 = vweird.f32 %v398_v1 }
 0x1a8   :  { %v400_v3 = vmul.f32 %v1566_v2, %v397_v61  ;;  %vm406_vm8 = vweird.f32 %v1566_v2  ;;  %v742_v61 = vld [vmem:[#allocation16 + $0x988] sm:$0xff] }
 0x1a9   :  { %vm407_vm10 = vmor %vm405_vm9, %vm406_vm8 }
 0x1aa   :  { %v401_v4 = vmul.f32 %v1566_v2, %v400_v3  ;;  %v717_v3 = vld [vmem:[#allocation16 + $0x8c0] sm:$0xff] }
 0x1ac   :  { %v402_v5 = vmul.f32 0.5, %v401_v4  ;;  %v490_v4 = vld [vmem:[#allocation16 + $0x1a8] sm:$0xff] }
 0x1ad   :  { %v1568_v6 = vpop.eup %1567 }
 0x1ae   :  { %v403_v7 = vsub.f32 1.5, %v402_v5  ;;  %v410_v9 = vmul.f32 %v1568_v6, %v398_v1  ;;  %vm416_vm11 = vweird.f32 %v1568_v6  ;;  %v730_v1 = vld [vmem:[#allocation16 + $0x928] sm:$0xff] }
 0x1af   :  { %vm417_vm13 = vmor %vm415_vm12, %vm416_vm11  ;;  %v718_v5 = vld [vmem:[#allocation16 + $0x8c8] sm:$0xff] }
 0x1b0   :  { %v404_v10 = vmul.f32 %v1566_v2, %v403_v7  ;;  %v411_v13 = vmul.f32 %v1568_v6, %v410_v9  ;;  %v705_v7 = vld [vmem:[#allocation16 + $0x860] sm:$0xff]  ;;  %v706_v9 = vld [vmem:[#allocation16 + $0x868] sm:$0xff] }
 0x1b2   :  { %v408_v15 = vsel %vm407_vm10, %v1566_v2, %v404_v10  ;;  %v412_v16 = vmul.f32 0.5, %v411_v13  ;;  %v489_v2 = vld [vmem:[#allocation16 + $0x1a0] sm:$0xff]  ;;  %v466_v13 = vld [vmem:[#allocation16 + $0xe8] sm:$0xff] }
 0x1b3   :  { %v419_v43 = vmul.f32 %v408_v15, %v2024_v12  ;;  %v609_v12 = vld [vmem:[#allocation16 + $0x560] sm:$0xff] }
 0x1b4   :  { %v413_v18 = vsub.f32 1.5, %v412_v16  ;;  %v465_v10 = vld [vmem:[#allocation16 + $0xe0] sm:$0xff] }
 0x1b5   :  { %v427_v19 = vmul.f32 %v423_v14, %v419_v43  ;;  %v694_v14 = vld [vmem:[#allocation16 + $0x808] sm:$0xff]  ;;  %v453_v15 = vld [vmem:[#allocation16 + $0x80] sm:$0xff] }
 0x1b6   :  { %v414_v20 = vmul.f32 %v1568_v6, %v413_v18  ;;  %v681_v16 = vld [vmem:[#allocation16 + $0x7a0] sm:$0xff]  ;;  %v454_v43 = vld [vmem:[#allocation16 + $0x88] sm:$0xff] }
 0x1b7   :  { %v2037_v21 = vadd.f32 %v431_v17, %v427_v19  ;;  %v682_v17 = vld [vmem:[#allocation16 + $0x7a8] sm:$0xff]  ;;  %v441_v18 = vld [vmem:[#allocation16 + $0x20] sm:$0xff] }
 0x1b8   :  { %v418_v25 = vsel %vm417_vm13, %v1568_v6, %v414_v20  ;;  %v477_v6 = vld [vmem:[#allocation16 + $0x140] sm:$0xff]  ;;  %v442_v20 = vld [vmem:[#allocation16 + $0x28] sm:$0xff] }
 0x1b9   :  { %v420_v26 = vmul.f32 %v418_v25, %v2030_v31  ;;  %865 = vmatmul.f32.vlgmr.msra.gmra.mxu3 %v2037_v21  ;;  %905 = vmatmul.f32.vlgmr.msrb.gmra.mxu1 %v2037_v21  ;;  %v586_v31 = vld [vmem:[#allocation16 + $0x4a8] sm:$0xff]  ;;  %v669_v19 = vld [vmem:[#allocation16 + $0x740] sm:$0xff] }
 0x1ba   :  { %1009 = vmatpush.msra.mxu3 %v621_v23  ;;  %1049 = vmatpush.msrb.mxu1 %v622_v24  ;;  %v623_v23 = vld [vmem:[#allocation16 + $0x5d0] sm:$0xff]  ;;  %v624_v24 = vld [vmem:[#allocation16 + $0x5d8] sm:$0xff]  ;;  %v657_v25 = vld [vmem:[#allocation16 + $0x6e0] sm:$0xff] }
 0x1bb   :  { %v428_v29 = vmul.f32 %v424_v22, %v420_v26  ;;  %v670_v22 = vld [vmem:[#allocation16 + $0x748] sm:$0xff] }
 0x1bc   :  { %1010 = vmatpush.msra.mxu3 %v609_v12  ;;  %1050 = vmatpush.msrb.mxu1 %v610_v28  ;;  %v658_v26 = vld [vmem:[#allocation16 + $0x6e8] sm:$0xff]  ;;  %v612_v12 = vld [vmem:[#allocation16 + $0x578] sm:$0xff]  ;;  %v645_v28 = vld [vmem:[#allocation16 + $0x680] sm:$0xff] }
 0x1bd   :  { %v2042_v33 = vadd.f32 %v432_v27, %v428_v29  ;;  %v611_v27 = vld [vmem:[#allocation16 + $0x570] sm:$0xff]  ;;  %v646_v29 = vld [vmem:[#allocation16 + $0x688] sm:$0xff] }
 0x1be   :  { %1011 = vmatpush.msra.mxu3 %v597_v30  ;;  %1051 = vmatpush.msrb.mxu1 %v598_v32  ;;  %v599_v30 = vld [vmem:[#allocation16 + $0x510] sm:$0xff]  ;;  %v600_v32 = vld [vmem:[#allocation16 + $0x518] sm:$0xff] }
 0x1bf   :  { %885 = vmatmul.f32.vlgmr.msrb.gmra.mxu0 %v2042_v33  ;;  %925 = vmatmul.f32.vlgmr.msrb.gmra.mxu2 %v2042_v33 }
 0x1c0   :  { %1012 = vmatpush.msra.mxu3 %v585_v34  ;;  %1029 = vmatpush.msrb.mxu0 %v813_v35  ;;  %v633_v34 = vld [vmem:[#allocation16 + $0x620] sm:$0xff]  ;;  %v634_v35 = vld [vmem:[#allocation16 + $0x628] sm:$0xff] }
 0x1c1   :  { %1052 = vmatpush.msrb.mxu1 %v586_v31  ;;  %1069 = vmatpush.msrb.mxu2 %v814_v36  ;;  %v587_v31 = vld [vmem:[#allocation16 + $0x4b0] sm:$0xff] }
 0x1c2   :  { %945 = vmatmul.f32.vlgmr.msrb.gmra.mxu3 %v2037_v21  ;;  %985 = vmatmul.f32.vlgmr.msra.gmra.mxu1 %v2037_v21  ;;  %v815_v36 = vld [vmem:[#allocation16 + $0xbd0] sm:$0xff] }
 0x1c3   :  { %1013 = vmatpush.msra.mxu3 %v573_v37  ;;  %1030 = vmatpush.msrb.mxu0 %v801_v38  ;;  %v588_v37 = vld [vmem:[#allocation16 + $0x4b8] sm:$0xff] }
 0x1c4   :  { %1053 = vmatpush.msrb.mxu1 %v574_v39  ;;  %1070 = vmatpush.msrb.mxu2 %v802_v40  ;;  %v816_v38 = vld [vmem:[#allocation16 + $0xbd8] sm:$0xff]  ;;  %v575_v39 = vld [vmem:[#allocation16 + $0x450] sm:$0xff] }
 0x1c5   :  { %1014 = vmatpush.msra.mxu3 %v561_v41  ;;  %1031 = vmatpush.msrb.mxu0 %v789_v42  ;;  %v803_v40 = vld [vmem:[#allocation16 + $0xb70] sm:$0xff]  ;;  %v576_v41 = vld [vmem:[#allocation16 + $0x458] sm:$0xff] }
 0x1c6   :  { %1054 = vmatpush.msrb.mxu1 %v562_v44  ;;  %1071 = vmatpush.msrb.mxu2 %v790_v45  ;;  %v804_v42 = vld [vmem:[#allocation16 + $0xb78] sm:$0xff]  ;;  %v563_v44 = vld [vmem:[#allocation16 + $0x3f0] sm:$0xff] }
 0x1c7   :  { %1015 = vmatpush.msra.mxu3 %v549_v46  ;;  %1032 = vmatpush.msrb.mxu0 %v777_v47  ;;  %v791_v45 = vld [vmem:[#allocation16 + $0xb10] sm:$0xff]  ;;  %v564_v46 = vld [vmem:[#allocation16 + $0x3f8] sm:$0xff] }
 0x1c8   :  { %1055 = vmatpush.msrb.mxu1 %v550_v48  ;;  %1072 = vmatpush.msrb.mxu2 %v778_v49  ;;  %v792_v47 = vld [vmem:[#allocation16 + $0xb18] sm:$0xff]  ;;  %v551_v48 = vld [vmem:[#allocation16 + $0x390] sm:$0xff] }
 0x1c9   :  { %965 = vmatmul.f32.vlgmr.msra.gmra.mxu0 %v2042_v33  ;;  %1005 = vmatmul.f32.vlgmr.msra.gmra.mxu2 %v2042_v33  ;;  %v779_v49 = vld [vmem:[#allocation16 + $0xab0] sm:$0xff] }
 0x1ca   :  { %1016 = vmatpush.msra.mxu3 %v537_v50  ;;  %1033 = vmatpush.msrb.mxu0 %v765_v51  ;;  %v552_v50 = vld [vmem:[#allocation16 + $0x398] sm:$0xff] }
 0x1cb   :  { %1056 = vmatpush.msrb.mxu1 %v538_v52  ;;  %1073 = vmatpush.msrb.mxu2 %v766_v53  ;;  %v780_v51 = vld [vmem:[#allocation16 + $0xab8] sm:$0xff]  ;;  %v539_v52 = vld [vmem:[#allocation16 + $0x330] sm:$0xff] }
 0x1cc   :  { %1017 = vmatpush.msra.mxu3 %v525_v54  ;;  %1034 = vmatpush.msrb.mxu0 %v753_v55  ;;  %v767_v53 = vld [vmem:[#allocation16 + $0xa50] sm:$0xff]  ;;  %v540_v54 = vld [vmem:[#allocation16 + $0x338] sm:$0xff] }
 0x1cd   :  { %1057 = vmatpush.msrb.mxu1 %v526_v56  ;;  %1074 = vmatpush.msrb.mxu2 %v754_v57  ;;  %v768_v55 = vld [vmem:[#allocation16 + $0xa58] sm:$0xff]  ;;  %v527_v56 = vld [vmem:[#allocation16 + $0x2d0] sm:$0xff] }
 0x1ce   :  { %1018 = vmatpush.msra.mxu3 %v513_v58  ;;  %1035 = vmatpush.msrb.mxu0 %v741_v59  ;;  %v755_v57 = vld [vmem:[#allocation16 + $0x9f0] sm:$0xff]  ;;  %v528_v58 = vld [vmem:[#allocation16 + $0x2d8] sm:$0xff] }
 0x1cf   :  { %1058 = vmatpush.msrb.mxu1 %v514_v60  ;;  %1075 = vmatpush.msrb.mxu2 %v742_v61  ;;  %v756_v59 = vld [vmem:[#allocation16 + $0x9f8] sm:$0xff]  ;;  %v515_v60 = vld [vmem:[#allocation16 + $0x270] sm:$0xff] }
 0x1d0   :  { %1019 = vmatpush.msra.mxu3 %v501_v62  ;;  %1036 = vmatpush.msrb.mxu0 %v729_v63  ;;  %v743_v61 = vld [vmem:[#allocation16 + $0x990] sm:$0xff]  ;;  %v516_v62 = vld [vmem:[#allocation16 + $0x278] sm:$0xff] }
 0x1d1   :  { %1059 = vmatpush.msrb.mxu1 %v502_v0  ;;  %1076 = vmatpush.msrb.mxu2 %v730_v1  ;;  %v744_v63 = vld [vmem:[#allocation16 + $0x998] sm:$0xff]  ;;  %v503_v0 = vld [vmem:[#allocation16 + $0x210] sm:$0xff] }
 0x1d2   :  { %1020 = vmatpush.msra.mxu3 %v489_v2  ;;  %1037 = vmatpush.msrb.mxu0 %v717_v3  ;;  %v731_v1 = vld [vmem:[#allocation16 + $0x930] sm:$0xff]  ;;  %v504_v2 = vld [vmem:[#allocation16 + $0x218] sm:$0xff] }
 0x1d3   :  { %1060 = vmatpush.msrb.mxu1 %v490_v4  ;;  %1077 = vmatpush.msrb.mxu2 %v718_v5  ;;  %v732_v3 = vld [vmem:[#allocation16 + $0x938] sm:$0xff]  ;;  %v491_v4 = vld [vmem:[#allocation16 + $0x1b0] sm:$0xff] }
 0x1d4   :  { %1021 = vmatpush.msra.mxu3 %v477_v6  ;;  %1038 = vmatpush.msrb.mxu0 %v705_v7  ;;  %v719_v5 = vld [vmem:[#allocation16 + $0x8d0] sm:$0xff]  ;;  %v492_v6 = vld [vmem:[#allocation16 + $0x1b8] sm:$0xff] }
 0x1d5   :  { %1061 = vmatpush.msrb.mxu1 %v478_v8  ;;  %1078 = vmatpush.msrb.mxu2 %v706_v9  ;;  %v720_v7 = vld [vmem:[#allocation16 + $0x8d8] sm:$0xff]  ;;  %v479_v8 = vld [vmem:[#allocation16 + $0x150] sm:$0xff] }
 0x1d6   :  { %1022 = vmatpush.msra.mxu3 %v465_v10  ;;  %1039 = vmatpush.msrb.mxu0 %v693_v11  ;;  %v707_v9 = vld [vmem:[#allocation16 + $0x870] sm:$0xff]  ;;  %v480_v10 = vld [vmem:[#allocation16 + $0x158] sm:$0xff] }
 0x1d7   :  { %1062 = vmatpush.msrb.mxu1 %v466_v13  ;;  %1079 = vmatpush.msrb.mxu2 %v694_v14  ;;  %v708_v11 = vld [vmem:[#allocation16 + $0x878] sm:$0xff]  ;;  %v467_v13 = vld [vmem:[#allocation16 + $0xf0] sm:$0xff] }
 0x1d8   :  { %1023 = vmatpush.msra.mxu3 %v453_v15  ;;  %1040 = vmatpush.msrb.mxu0 %v681_v16  ;;  %v695_v14 = vld [vmem:[#allocation16 + $0x810] sm:$0xff]  ;;  %v468_v15 = vld [vmem:[#allocation16 + $0xf8] sm:$0xff] }
 0x1d9   :  { %1063 = vmatpush.msrb.mxu1 %v454_v43  ;;  %1080 = vmatpush.msrb.mxu2 %v682_v17  ;;  %v696_v16 = vld [vmem:[#allocation16 + $0x818] sm:$0xff]  ;;  %v455_v43 = vld [vmem:[#allocation16 + $0x90] sm:$0xff] }
 0x1da   :  { %1024 = vmatpush.msra.mxu3 %v441_v18  ;;  %1041 = vmatpush.msrb.mxu0 %v669_v19  ;;  %v683_v17 = vld [vmem:[#allocation16 + $0x7b0] sm:$0xff]  ;;  %v456_v18 = vld [vmem:[#allocation16 + $0x98] sm:$0xff] }
 0x1db   :  { %1064 = vmatpush.msrb.mxu1 %v442_v20  ;;  %1081 = vmatpush.msrb.mxu2 %v670_v22  ;;  %v684_v19 = vld [vmem:[#allocation16 + $0x7b8] sm:$0xff]  ;;  %v443_v20 = vld [vmem:[#allocation16 + $0x30] sm:$0xff] }
 0x1dc   :  { %1025 = vmatmul.f32.vlgmr.msra.gmra.mxu3 %v2037_v21  ;;  %1065 = vmatmul.f32.vlgmr.msrb.gmra.mxu1 %v2037_v21  ;;  %v671_v22 = vld [vmem:[#allocation16 + $0x750] sm:$0xff] }
 0x1dd   :  { %1089 = vmatpush.msrb.mxu3 %v623_v23  ;;  %1129 = vmatpush.msra.mxu1 %v624_v24  ;;  %v444_v23 = vld [vmem:[#allocation16 + $0x38] sm:$0xff] }
 0x1de   :  { %1042 = vmatpush.msrb.mxu0 %v657_v25  ;;  %1082 = vmatpush.msrb.mxu2 %v658_v26  ;;  %v672_v24 = vld [vmem:[#allocation16 + $0x758] sm:$0xff]  ;;  %v625_v25 = vld [vmem:[#allocation16 + $0x5e0] sm:$0xff]  ;;  %v626_v26 = vld [vmem:[#allocation16 + $0x5e8] sm:$0xff] }
 0x1df   :  { %1090 = vmatpush.msrb.mxu3 %v611_v27  ;;  %1130 = vmatpush.msra.mxu1 %v612_v12  ;;  %v659_v27 = vld [vmem:[#allocation16 + $0x6f0] sm:$0xff]  ;;  %v660_v12 = vld [vmem:[#allocation16 + $0x6f8] sm:$0xff] }
 0x1e0   :  { %1043 = vmatpush.msrb.mxu0 %v645_v28  ;;  %1083 = vmatpush.msrb.mxu2 %v646_v29  ;;  %v613_v28 = vld [vmem:[#allocation16 + $0x580] sm:$0xff]  ;;  %v614_v29 = vld [vmem:[#allocation16 + $0x588] sm:$0xff] }
 0x1e1   :  { %1091 = vmatpush.msrb.mxu3 %v599_v30  ;;  %1131 = vmatpush.msra.mxu1 %v600_v32  ;;  %v647_v30 = vld [vmem:[#allocation16 + $0x690] sm:$0xff]  ;;  %v648_v32 = vld [vmem:[#allocation16 + $0x698] sm:$0xff] }
 0x1e2   :  { %1044 = vmatpush.msrb.mxu0 %v633_v34  ;;  %1084 = vmatpush.msrb.mxu2 %v634_v35  ;;  %v601_v34 = vld [vmem:[#allocation16 + $0x520] sm:$0xff]  ;;  %v602_v35 = vld [vmem:[#allocation16 + $0x528] sm:$0xff] }
 0x1e3   :  { %1045 = vmatmul.f32.vlgmr.msrb.gmra.mxu0 %v2042_v33  ;;  %1085 = vmatmul.f32.vlgmr.msrb.gmra.mxu2 %v2042_v33 }
 0x1e4   :  { %1092 = vmatpush.msrb.mxu3 %v587_v31  ;;  %1109 = vmatpush.msra.mxu0 %v815_v36  ;;  %v635_v31 = vld [vmem:[#allocation16 + $0x630] sm:$0xff]  ;;  %v636_v36 = vld [vmem:[#allocation16 + $0x638] sm:$0xff] }
 0x1e5   :  { %1132 = vmatpush.msra.mxu1 %v588_v37  ;;  %1149 = vmatpush.msra.mxu2 %v816_v38  ;;  %v589_v37 = vld [vmem:[#allocation16 + $0x4c0] sm:$0xff] }
 0x1e6   :  { %1093 = vmatpush.msrb.mxu3 %v575_v39  ;;  %1110 = vmatpush.msra.mxu0 %v803_v40  ;;  %v817_v38 = vld [vmem:[#allocation16 + $0xbe0] sm:$0xff]  ;;  %v590_v39 = vld [vmem:[#allocation16 + $0x4c8] sm:$0xff] }
 0x1e7   :  { %1133 = vmatpush.msra.mxu1 %v576_v41  ;;  %1150 = vmatpush.msra.mxu2 %v804_v42  ;;  %v818_v40 = vld [vmem:[#allocation16 + $0xbe8] sm:$0xff]  ;;  %v577_v41 = vld [vmem:[#allocation16 + $0x460] sm:$0xff] }
 0x1e8   :  { %1094 = vmatpush.msrb.mxu3 %v563_v44  ;;  %1111 = vmatpush.msra.mxu0 %v791_v45  ;;  %v805_v42 = vld [vmem:[#allocation16 + $0xb80] sm:$0xff]  ;;  %v578_v44 = vld [vmem:[#allocation16 + $0x468] sm:$0xff] }
 0x1e9   :  { %1134 = vmatpush.msra.mxu1 %v564_v46  ;;  %1151 = vmatpush.msra.mxu2 %v792_v47  ;;  %v806_v45 = vld [vmem:[#allocation16 + $0xb88] sm:$0xff]  ;;  %v565_v46 = vld [vmem:[#allocation16 + $0x400] sm:$0xff] }
 0x1ea   :  { %1095 = vmatpush.msrb.mxu3 %v551_v48  ;;  %1112 = vmatpush.msra.mxu0 %v779_v49  ;;  %v793_v47 = vld [vmem:[#allocation16 + $0xb20] sm:$0xff]  ;;  %v566_v48 = vld [vmem:[#allocation16 + $0x408] sm:$0xff] }
 0x1eb   :  { %1135 = vmatpush.msra.mxu1 %v552_v50  ;;  %1152 = vmatpush.msra.mxu2 %v780_v51  ;;  %v794_v49 = vld [vmem:[#allocation16 + $0xb28] sm:$0xff]  ;;  %v553_v50 = vld [vmem:[#allocation16 + $0x3a0] sm:$0xff] }
 0x1ec   :  { %1096 = vmatpush.msrb.mxu3 %v539_v52  ;;  %1113 = vmatpush.msra.mxu0 %v767_v53  ;;  %v781_v51 = vld [vmem:[#allocation16 + $0xac0] sm:$0xff]  ;;  %v554_v52 = vld [vmem:[#allocation16 + $0x3a8] sm:$0xff] }
 0x1ed   :  { %1136 = vmatpush.msra.mxu1 %v540_v54  ;;  %1153 = vmatpush.msra.mxu2 %v768_v55  ;;  %v782_v53 = vld [vmem:[#allocation16 + $0xac8] sm:$0xff]  ;;  %v541_v54 = vld [vmem:[#allocation16 + $0x340] sm:$0xff] }
 0x1ee   :  { %1097 = vmatpush.msrb.mxu3 %v527_v56  ;;  %1114 = vmatpush.msra.mxu0 %v755_v57  ;;  %v769_v55 = vld [vmem:[#allocation16 + $0xa60] sm:$0xff]  ;;  %v542_v56 = vld [vmem:[#allocation16 + $0x348] sm:$0xff] }
 0x1ef   :  { %1137 = vmatpush.msra.mxu1 %v528_v58  ;;  %1154 = vmatpush.msra.mxu2 %v756_v59  ;;  %v770_v57 = vld [vmem:[#allocation16 + $0xa68] sm:$0xff]  ;;  %v529_v58 = vld [vmem:[#allocation16 + $0x2e0] sm:$0xff] }
 0x1f0   :  { %1098 = vmatpush.msrb.mxu3 %v515_v60  ;;  %1115 = vmatpush.msra.mxu0 %v743_v61  ;;  %v757_v59 = vld [vmem:[#allocation16 + $0xa00] sm:$0xff]  ;;  %v530_v60 = vld [vmem:[#allocation16 + $0x2e8] sm:$0xff] }
 0x1f1   :  { %1138 = vmatpush.msra.mxu1 %v516_v62  ;;  %1155 = vmatpush.msra.mxu2 %v744_v63  ;;  %v758_v61 = vld [vmem:[#allocation16 + $0xa08] sm:$0xff]  ;;  %v517_v62 = vld [vmem:[#allocation16 + $0x280] sm:$0xff] }
 0x1f2   :  { %1099 = vmatpush.msrb.mxu3 %v503_v0  ;;  %1116 = vmatpush.msra.mxu0 %v731_v1  ;;  %v745_v63 = vld [vmem:[#allocation16 + $0x9a0] sm:$0xff]  ;;  %v518_v0 = vld [vmem:[#allocation16 + $0x288] sm:$0xff] }
 0x1f3   :  { %1139 = vmatpush.msra.mxu1 %v504_v2  ;;  %1156 = vmatpush.msra.mxu2 %v732_v3  ;;  %v746_v1 = vld [vmem:[#allocation16 + $0x9a8] sm:$0xff]  ;;  %v505_v2 = vld [vmem:[#allocation16 + $0x220] sm:$0xff] }
 0x1f4   :  { %1100 = vmatpush.msrb.mxu3 %v491_v4  ;;  %1117 = vmatpush.msra.mxu0 %v719_v5  ;;  %v733_v3 = vld [vmem:[#allocation16 + $0x940] sm:$0xff]  ;;  %v506_v4 = vld [vmem:[#allocation16 + $0x228] sm:$0xff] }
 0x1f5   :  { %1140 = vmatpush.msra.mxu1 %v492_v6  ;;  %1157 = vmatpush.msra.mxu2 %v720_v7  ;;  %v734_v5 = vld [vmem:[#allocation16 + $0x948] sm:$0xff]  ;;  %v493_v6 = vld [vmem:[#allocation16 + $0x1c0] sm:$0xff] }
 0x1f6   :  { %1101 = vmatpush.msrb.mxu3 %v479_v8  ;;  %1118 = vmatpush.msra.mxu0 %v707_v9  ;;  %v721_v7 = vld [vmem:[#allocation16 + $0x8e0] sm:$0xff]  ;;  %v494_v8 = vld [vmem:[#allocation16 + $0x1c8] sm:$0xff] }
 0x1f7   :  { %1141 = vmatpush.msra.mxu1 %v480_v10  ;;  %1158 = vmatpush.msra.mxu2 %v708_v11  ;;  %v722_v9 = vld [vmem:[#allocation16 + $0x8e8] sm:$0xff]  ;;  %v481_v10 = vld [vmem:[#allocation16 + $0x160] sm:$0xff] }
 0x1f8   :  { %1102 = vmatpush.msrb.mxu3 %v467_v13  ;;  %1119 = vmatpush.msra.mxu0 %v695_v14  ;;  %v709_v11 = vld [vmem:[#allocation16 + $0x880] sm:$0xff]  ;;  %v482_v13 = vld [vmem:[#allocation16 + $0x168] sm:$0xff] }
 0x1f9   :  { %1142 = vmatpush.msra.mxu1 %v468_v15  ;;  %1159 = vmatpush.msra.mxu2 %v696_v16  ;;  %v710_v14 = vld [vmem:[#allocation16 + $0x888] sm:$0xff]  ;;  %v469_v15 = vld [vmem:[#allocation16 + $0x100] sm:$0xff] }
 0x1fa   :  { %1103 = vmatpush.msrb.mxu3 %v455_v43  ;;  %1120 = vmatpush.msra.mxu0 %v683_v17  ;;  %v697_v16 = vld [vmem:[#allocation16 + $0x820] sm:$0xff]  ;;  %v470_v43 = vld [vmem:[#allocation16 + $0x108] sm:$0xff] }
 0x1fb   :  { %1143 = vmatpush.msra.mxu1 %v456_v18  ;;  %1160 = vmatpush.msra.mxu2 %v684_v19  ;;  %v698_v17 = vld [vmem:[#allocation16 + $0x828] sm:$0xff]  ;;  %v457_v18 = vld [vmem:[#allocation16 + $0xa0] sm:$0xff] }
 0x1fc   :  { %1104 = vmatpush.msrb.mxu3 %v443_v20  ;;  %1121 = vmatpush.msra.mxu0 %v671_v22  ;;  %v685_v19 = vld [vmem:[#allocation16 + $0x7c0] sm:$0xff]  ;;  %v458_v20 = vld [vmem:[#allocation16 + $0xa8] sm:$0xff] }
 0x1fd   :  { %1144 = vmatpush.msra.mxu1 %v444_v23  ;;  %1161 = vmatpush.msra.mxu2 %v672_v24  ;;  %v686_v22 = vld [vmem:[#allocation16 + $0x7c8] sm:$0xff]  ;;  %v445_v23 = vld [vmem:[#allocation16 + $0x40] sm:$0xff] }
 0x1fe   :  { %1105 = vmatmul.f32.vlgmr.msrb.gmra.mxu3 %v2037_v21  ;;  %1145 = vmatmul.f32.vlgmr.msra.gmra.mxu1 %v2037_v21  ;;  %v673_v24 = vld [vmem:[#allocation16 + $0x760] sm:$0xff] }
 0x1ff   :  { %1169 = vmatpush.msra.mxu3 %v625_v25  ;;  %1209 = vmatpush.msrb.mxu1 %v626_v26  ;;  %v446_v25 = vld [vmem:[#allocation16 + $0x48] sm:$0xff] }
 0x200   :  { %1122 = vmatpush.msra.mxu0 %v659_v27  ;;  %1162 = vmatpush.msra.mxu2 %v660_v12  ;;  %v674_v26 = vld [vmem:[#allocation16 + $0x768] sm:$0xff]  ;;  %v627_v27 = vld [vmem:[#allocation16 + $0x5f0] sm:$0xff]  ;;  %v628_v12 = vld [vmem:[#allocation16 + $0x5f8] sm:$0xff] }
 0x201   :  { %1170 = vmatpush.msra.mxu3 %v613_v28  ;;  %1210 = vmatpush.msrb.mxu1 %v614_v29  ;;  %v661_v28 = vld [vmem:[#allocation16 + $0x700] sm:$0xff]  ;;  %v662_v29 = vld [vmem:[#allocation16 + $0x708] sm:$0xff] }
 0x202   :  { %1123 = vmatpush.msra.mxu0 %v647_v30  ;;  %1163 = vmatpush.msra.mxu2 %v648_v32  ;;  %v615_v30 = vld [vmem:[#allocation16 + $0x590] sm:$0xff]  ;;  %v616_v32 = vld [vmem:[#allocation16 + $0x598] sm:$0xff] }
 0x203   :  { %1171 = vmatpush.msra.mxu3 %v601_v34  ;;  %1211 = vmatpush.msrb.mxu1 %v602_v35  ;;  %v649_v34 = vld [vmem:[#allocation16 + $0x6a0] sm:$0xff]  ;;  %v650_v35 = vld [vmem:[#allocation16 + $0x6a8] sm:$0xff] }
 0x204   :  { %1124 = vmatpush.msra.mxu0 %v635_v31  ;;  %1164 = vmatpush.msra.mxu2 %v636_v36  ;;  %v603_v31 = vld [vmem:[#allocation16 + $0x530] sm:$0xff]  ;;  %v604_v36 = vld [vmem:[#allocation16 + $0x538] sm:$0xff] }
 0x205   :  { %1125 = vmatmul.f32.vlgmr.msra.gmra.mxu0 %v2042_v33  ;;  %1165 = vmatmul.f32.vlgmr.msra.gmra.mxu2 %v2042_v33 }
 0x206   :  { %1172 = vmatpush.msra.mxu3 %v589_v37  ;;  %1189 = vmatpush.msrb.mxu0 %v817_v38  ;;  %v637_v37 = vld [vmem:[#allocation16 + $0x640] sm:$0xff]  ;;  %v638_v38 = vld [vmem:[#allocation16 + $0x648] sm:$0xff] }
 0x207   :  { %1212 = vmatpush.msrb.mxu1 %v590_v39  ;;  %1229 = vmatpush.msrb.mxu2 %v818_v40  ;;  %v591_v39 = vld [vmem:[#allocation16 + $0x4d0] sm:$0xff] }
 0x208   :  { %1173 = vmatpush.msra.mxu3 %v577_v41  ;;  %1190 = vmatpush.msrb.mxu0 %v805_v42  ;;  %v819_v40 = vld [vmem:[#allocation16 + $0xbf0] sm:$0xff]  ;;  %v592_v41 = vld [vmem:[#allocation16 + $0x4d8] sm:$0xff] }
 0x209   :  { %1213 = vmatpush.msrb.mxu1 %v578_v44  ;;  %1230 = vmatpush.msrb.mxu2 %v806_v45  ;;  %v820_v42 = vld [vmem:[#allocation16 + $0xbf8] sm:$0xff]  ;;  %v579_v44 = vld [vmem:[#allocation16 + $0x470] sm:$0xff] }
 0x20a   :  { %1174 = vmatpush.msra.mxu3 %v565_v46  ;;  %1191 = vmatpush.msrb.mxu0 %v793_v47  ;;  %v807_v45 = vld [vmem:[#allocation16 + $0xb90] sm:$0xff]  ;;  %v580_v46 = vld [vmem:[#allocation16 + $0x478] sm:$0xff] }
 0x20b   :  { %1214 = vmatpush.msrb.mxu1 %v566_v48  ;;  %1231 = vmatpush.msrb.mxu2 %v794_v49  ;;  %v808_v47 = vld [vmem:[#allocation16 + $0xb98] sm:$0xff]  ;;  %v567_v48 = vld [vmem:[#allocation16 + $0x410] sm:$0xff] }
 0x20c   :  { %1175 = vmatpush.msra.mxu3 %v553_v50  ;;  %1192 = vmatpush.msrb.mxu0 %v781_v51  ;;  %v795_v49 = vld [vmem:[#allocation16 + $0xb30] sm:$0xff]  ;;  %v568_v50 = vld [vmem:[#allocation16 + $0x418] sm:$0xff] }
 0x20d   :  { %1215 = vmatpush.msrb.mxu1 %v554_v52  ;;  %1232 = vmatpush.msrb.mxu2 %v782_v53  ;;  %v796_v51 = vld [vmem:[#allocation16 + $0xb38] sm:$0xff]  ;;  %v555_v52 = vld [vmem:[#allocation16 + $0x3b0] sm:$0xff] }
 0x20e   :  { %1176 = vmatpush.msra.mxu3 %v541_v54  ;;  %1193 = vmatpush.msrb.mxu0 %v769_v55  ;;  %v783_v53 = vld [vmem:[#allocation16 + $0xad0] sm:$0xff]  ;;  %v556_v54 = vld [vmem:[#allocation16 + $0x3b8] sm:$0xff] }
 0x20f   :  { %1216 = vmatpush.msrb.mxu1 %v542_v56  ;;  %1233 = vmatpush.msrb.mxu2 %v770_v57  ;;  %v784_v55 = vld [vmem:[#allocation16 + $0xad8] sm:$0xff]  ;;  %v543_v56 = vld [vmem:[#allocation16 + $0x350] sm:$0xff] }
 0x210   :  { %1177 = vmatpush.msra.mxu3 %v529_v58  ;;  %1194 = vmatpush.msrb.mxu0 %v757_v59  ;;  %v771_v57 = vld [vmem:[#allocation16 + $0xa70] sm:$0xff]  ;;  %v544_v58 = vld [vmem:[#allocation16 + $0x358] sm:$0xff] }
 0x211   :  { %1217 = vmatpush.msrb.mxu1 %v530_v60  ;;  %1234 = vmatpush.msrb.mxu2 %v758_v61  ;;  %v772_v59 = vld [vmem:[#allocation16 + $0xa78] sm:$0xff]  ;;  %v531_v60 = vld [vmem:[#allocation16 + $0x2f0] sm:$0xff] }
 0x212   :  { %1178 = vmatpush.msra.mxu3 %v517_v62  ;;  %1195 = vmatpush.msrb.mxu0 %v745_v63  ;;  %v759_v61 = vld [vmem:[#allocation16 + $0xa10] sm:$0xff]  ;;  %v532_v62 = vld [vmem:[#allocation16 + $0x2f8] sm:$0xff] }
 0x213   :  { %1218 = vmatpush.msrb.mxu1 %v518_v0  ;;  %1235 = vmatpush.msrb.mxu2 %v746_v1  ;;  %v760_v63 = vld [vmem:[#allocation16 + $0xa18] sm:$0xff]  ;;  %v519_v0 = vld [vmem:[#allocation16 + $0x290] sm:$0xff] }
 0x214   :  { %1179 = vmatpush.msra.mxu3 %v505_v2  ;;  %1196 = vmatpush.msrb.mxu0 %v733_v3  ;;  %v747_v1 = vld [vmem:[#allocation16 + $0x9b0] sm:$0xff]  ;;  %v520_v2 = vld [vmem:[#allocation16 + $0x298] sm:$0xff] }
 0x215   :  { %1219 = vmatpush.msrb.mxu1 %v506_v4  ;;  %1236 = vmatpush.msrb.mxu2 %v734_v5  ;;  %v748_v3 = vld [vmem:[#allocation16 + $0x9b8] sm:$0xff]  ;;  %v507_v4 = vld [vmem:[#allocation16 + $0x230] sm:$0xff] }
 0x216   :  { %1180 = vmatpush.msra.mxu3 %v493_v6  ;;  %1197 = vmatpush.msrb.mxu0 %v721_v7  ;;  %v735_v5 = vld [vmem:[#allocation16 + $0x950] sm:$0xff]  ;;  %v508_v6 = vld [vmem:[#allocation16 + $0x238] sm:$0xff] }
 0x217   :  { %1220 = vmatpush.msrb.mxu1 %v494_v8  ;;  %1237 = vmatpush.msrb.mxu2 %v722_v9  ;;  %v736_v7 = vld [vmem:[#allocation16 + $0x958] sm:$0xff]  ;;  %v495_v8 = vld [vmem:[#allocation16 + $0x1d0] sm:$0xff] }
 0x218   :  { %1181 = vmatpush.msra.mxu3 %v481_v10  ;;  %1198 = vmatpush.msrb.mxu0 %v709_v11  ;;  %v723_v9 = vld [vmem:[#allocation16 + $0x8f0] sm:$0xff]  ;;  %v496_v10 = vld [vmem:[#allocation16 + $0x1d8] sm:$0xff] }
 0x219   :  { %1221 = vmatpush.msrb.mxu1 %v482_v13  ;;  %1238 = vmatpush.msrb.mxu2 %v710_v14  ;;  %v724_v11 = vld [vmem:[#allocation16 + $0x8f8] sm:$0xff]  ;;  %v483_v13 = vld [vmem:[#allocation16 + $0x170] sm:$0xff] }
 0x21a   :  { %1182 = vmatpush.msra.mxu3 %v469_v15  ;;  %1199 = vmatpush.msrb.mxu0 %v697_v16  ;;  %v711_v14 = vld [vmem:[#allocation16 + $0x890] sm:$0xff]  ;;  %v484_v15 = vld [vmem:[#allocation16 + $0x178] sm:$0xff] }
 0x21b   :  { %1222 = vmatpush.msrb.mxu1 %v470_v43  ;;  %1239 = vmatpush.msrb.mxu2 %v698_v17  ;;  %v712_v16 = vld [vmem:[#allocation16 + $0x898] sm:$0xff]  ;;  %v2062_v43 = vld [vmem:[#allocation18] sm:$0xff]  ;;  %v471_v17 = vld [vmem:[#allocation16 + $0x110] sm:$0xff] }
 0x21c   :  { %1183 = vmatpush.msra.mxu3 %v457_v18  ;;  %1200 = vmatpush.msrb.mxu0 %v685_v19  ;;  %v699_v18 = vld [vmem:[#allocation16 + $0x830] sm:$0xff]  ;;  %v825_v19 = vperm.slane %v2062_v43, 0 }
 0x21d   :  { %1223 = vmatpush.msrb.mxu1 %v458_v20  ;;  %1240 = vmatpush.msrb.mxu2 %v686_v22  ;;  %v472_v20 = vld [vmem:[#allocation16 + $0x118] sm:$0xff] }
 0x21e   :  { %1184 = vmatpush.msra.mxu3 %v445_v23  ;;  %1201 = vmatpush.msrb.mxu0 %v673_v24  ;;  %v700_v22 = vld [vmem:[#allocation16 + $0x838] sm:$0xff]  ;;  %v459_v23 = vld [vmem:[#allocation16 + $0xb0] sm:$0xff] }
 0x21f   :  { %1224 = vmatpush.msrb.mxu1 %v446_v25  ;;  %1241 = vmatpush.msrb.mxu2 %v674_v26  ;;  %v687_v24 = vld [vmem:[#allocation16 + $0x7d0] sm:$0xff]  ;;  %v460_v25 = vld [vmem:[#allocation16 + $0xb8] sm:$0xff] }
 0x220   :  { %1185 = vmatmul.f32.vlgmr.msra.gmra.mxu3 %v2037_v21  ;;  %1225 = vmatmul.f32.vlgmr.msrb.gmra.mxu1 %v2037_v21  ;;  %v688_v26 = vld [vmem:[#allocation16 + $0x7d8] sm:$0xff] }
 0x221   :  { %1249 = vmatpush.msrb.mxu3 %v627_v27  ;;  %1289 = vmatpush.msra.mxu1 %v628_v12  ;;  %v447_v12 = vld [vmem:[#allocation16 + $0x50] sm:$0xff] }
 0x222   :  { %1202 = vmatpush.msrb.mxu0 %v661_v28  ;;  %1242 = vmatpush.msrb.mxu2 %v662_v29  ;;  %v675_v28 = vld [vmem:[#allocation16 + $0x770] sm:$0xff]  ;;  %v826_v29 = vperm.slane %v2062_v43, 1 }
 0x223   :  { %1250 = vmatpush.msrb.mxu3 %v615_v30  ;;  %1290 = vmatpush.msra.mxu1 %v616_v32 }
 0x224   :  { %1203 = vmatpush.msrb.mxu0 %v649_v34  ;;  %1243 = vmatpush.msrb.mxu2 %v650_v35  ;;  %v448_v34 = vld [vmem:[#allocation16 + $0x58] sm:$0xff] }
 0x225   :  { %1251 = vmatpush.msrb.mxu3 %v603_v31  ;;  %1291 = vmatpush.msra.mxu1 %v604_v36  ;;  %v676_v35 = vld [vmem:[#allocation16 + $0x778] sm:$0xff] }
 0x226   :  { %1204 = vmatpush.msrb.mxu0 %v637_v37  ;;  %1244 = vmatpush.msrb.mxu2 %v638_v38  ;;  %v663_v37 = vld [vmem:[#allocation16 + $0x710] sm:$0xff]  ;;  %v664_v38 = vld [vmem:[#allocation16 + $0x718] sm:$0xff] }
 0x227   :  { %1205 = vmatmul.f32.vlgmr.msrb.gmra.mxu0 %v2042_v33  ;;  %1245 = vmatmul.f32.vlgmr.msrb.gmra.mxu2 %v2042_v33 }
 0x228   :  { %1252 = vmatpush.msrb.mxu3 %v591_v39  ;;  %1269 = vmatpush.msra.mxu0 %v819_v40 }
 0x229   :  { %1292 = vmatpush.msra.mxu1 %v592_v41  ;;  %1309 = vmatpush.msra.mxu2 %v820_v42  ;;  %v651_v41 = vld [vmem:[#allocation16 + $0x6b0] sm:$0xff]  ;;  %v652_v42 = vld [vmem:[#allocation16 + $0x6b8] sm:$0xff] }
 0x22a   :  { %1253 = vmatpush.msrb.mxu3 %v579_v44  ;;  %1270 = vmatpush.msra.mxu0 %v807_v45  ;;  %v827_v45 = vperm.slane %v2062_v43, 2 }
 0x22b   :  { %1293 = vmatpush.msra.mxu1 %v580_v46  ;;  %1310 = vmatpush.msra.mxu2 %v808_v47 }
 0x22c   :  { %1254 = vmatpush.msrb.mxu3 %v567_v48  ;;  %1271 = vmatpush.msra.mxu0 %v795_v49  ;;  %v639_v48 = vld [vmem:[#allocation16 + $0x650] sm:$0xff]  ;;  %v640_v49 = vld [vmem:[#allocation16 + $0x658] sm:$0xff] }
 0x22d   :  { %1294 = vmatpush.msra.mxu1 %v568_v50  ;;  %1311 = vmatpush.msra.mxu2 %v796_v51 }
 0x22e   :  { %1255 = vmatpush.msrb.mxu3 %v555_v52  ;;  %1272 = vmatpush.msra.mxu0 %v783_v53 }
 0x22f   :  { %1295 = vmatpush.msra.mxu1 %v556_v54  ;;  %1312 = vmatpush.msra.mxu2 %v784_v55 }
 0x230   :  { %1256 = vmatpush.msrb.mxu3 %v543_v56  ;;  %1273 = vmatpush.msra.mxu0 %v771_v57 }
 0x231   :  { %1296 = vmatpush.msra.mxu1 %v544_v58  ;;  %1313 = vmatpush.msra.mxu2 %v772_v59 }
 0x232   :  { %1257 = vmatpush.msrb.mxu3 %v531_v60  ;;  %1274 = vmatpush.msra.mxu0 %v759_v61 }
 0x233   :  { %1297 = vmatpush.msra.mxu1 %v532_v62  ;;  %1314 = vmatpush.msra.mxu2 %v760_v63 }
 0x234   :  { %1258 = vmatpush.msrb.mxu3 %v519_v0  ;;  %1275 = vmatpush.msra.mxu0 %v747_v1 }
 0x235   :  { %1298 = vmatpush.msra.mxu1 %v520_v2  ;;  %1315 = vmatpush.msra.mxu2 %v748_v3  ;;  %v829_v3 = vperm.slane %v2062_v43, 4 }
 0x236   :  { %1259 = vmatpush.msrb.mxu3 %v507_v4  ;;  %1276 = vmatpush.msra.mxu0 %v735_v5  ;;  %v906_v31 = vpop.f32.mrf.mxu1 }
 0x237   :  { %1299 = vmatpush.msra.mxu1 %v508_v6  ;;  %1316 = vmatpush.msra.mxu2 %v736_v7  ;;  %v907_v39 = vadd.f32 %v906_v31, %v826_v29  ;;  %v830_v6 = vperm.slane %v2062_v43, 5 }
 0x238   :  { %1260 = vmatpush.msrb.mxu3 %v495_v8  ;;  %1277 = vmatpush.msra.mxu0 %v723_v9 }
 0x239   :  { %1300 = vmatpush.msra.mxu1 %v496_v10  ;;  %1317 = vmatpush.msra.mxu2 %v724_v11 }
 0x23a   :  { %1261 = vmatpush.msrb.mxu3 %v483_v13  ;;  %1278 = vmatpush.msra.mxu0 %v711_v14 }
 0x23b   :  { %1301 = vmatpush.msra.mxu1 %v484_v15  ;;  %1318 = vmatpush.msra.mxu2 %v712_v16 }
 0x23c   :  { %1262 = vmatpush.msrb.mxu3 %v471_v17  ;;  %1279 = vmatpush.msra.mxu0 %v699_v18  ;;  %v866_v27 = vpop.f32.mrf.mxu3  ;;  %v886_v32 = vpop.f32.mrf.mxu0 }
 0x23d   :  { %1302 = vmatpush.msra.mxu1 %v472_v20  ;;  %1319 = vmatpush.msra.mxu2 %v700_v22  ;;  %v867_v30 = vadd.f32 %v866_v27, %v825_v19 }
 0x23e   :  { %1263 = vmatpush.msrb.mxu3 %v459_v23  ;;  %1280 = vmatpush.msra.mxu0 %v687_v24 }
 0x23f   :  { %1303 = vmatpush.msra.mxu1 %v460_v25  ;;  %1320 = vmatpush.msra.mxu2 %v688_v26  ;;  %v887_v36 = vadd.f32 %v886_v32, %v867_v30  ;;  %v986_v55 = vpop.f32.mrf.mxu1 }
 0x240   :  { %1264 = vmatpush.msrb.mxu3 %v447_v12  ;;  %1281 = vmatpush.msra.mxu0 %v675_v28 }
 0x241   :  { %1304 = vmatpush.msra.mxu1 %v448_v34  ;;  %1321 = vmatpush.msra.mxu2 %v676_v35  ;;  %v1528_v40 = vclamps-f32 %v887_v36, 30.0  ;;  %v831_v35 = vperm.slane %v2062_v43, 6 }
 0x242   :  { %1265 = vmatmul.f32.vlgmr.msrb.gmra.mxu3 %v2037_v21  ;;  %1305 = vmatmul.f32.vlgmr.msra.gmra.mxu1 %v2037_v21  ;;  %v926_v44 = vpop.f32.mrf.mxu2  ;;  %v828_v21 = vperm.slane %v2062_v43, 3 }
 0x243   :  { %1282 = vmatpush.msra.mxu0 %v663_v37  ;;  %1322 = vmatpush.msra.mxu2 %v664_v38  ;;  %v1337_v46 = vmul.f32 1.442695, %v1528_v40  ;;  %v927_v47 = vadd.f32 %v926_v44, %v907_v39  ;;  %v832_v44 = vperm.slane %v2062_v43, 7 }
 0x244   :  { %v987_v59 = vadd.f32 %v986_v55, %v828_v21 }
 0x245   :  { %1283 = vmatpush.msra.mxu0 %v651_v41  ;;  %1323 = vmatpush.msra.mxu2 %v652_v42  ;;  %1569 = vpow2.f32 %v1337_v46  ;;  %v1529_v50 = vclamps-f32 %v927_v47, 30.0  ;;  %v946_v51 = vpop.f32.mrf.mxu3 }
 0x246   :  { %v947_v52 = vadd.f32 %v946_v51, %v827_v45  ;;  %v966_v54 = vpop.f32.mrf.mxu0 }
 0x247   :  { %1284 = vmatpush.msra.mxu0 %v639_v48  ;;  %1324 = vmatpush.msra.mxu2 %v640_v49  ;;  %v1339_v53 = vmul.f32 1.442695, %v1529_v50 }
 0x248   :  { %1285 = vmatmul.f32.vlgmr.msra.gmra.mxu0 %v2042_v33  ;;  %1325 = vmatmul.f32.vlgmr.msra.gmra.mxu2 %v2042_v33  ;;  %v967_v56 = vadd.f32 %v966_v54, %v947_v52 }
 0x249   :  { %1571 = vpow2.f32 %v1339_v53 }
 0x24a   :  { %v1530_v57 = vclamps-f32 %v967_v56, 30.0 }
 0x24b   :  { %v1570_v58 = vpop.eup %1569 }
 0x24c   :  { %1345 = vst [vmem:[%s2129_s11] sm:$0xff] %v1570_v58  ;;  %v1341_v60 = vmul.f32 1.442695, %v1530_v57  ;;  %v1006_v61 = vpop.f32.mrf.mxu2 }
 0x24d   :  { %v1007_v62 = vadd.f32 %v1006_v61, %v987_v59 }
 0x24e   :  { %1573 = vpow2.f32 %v1341_v60 }
 0x24f   :  { %v1572_v63 = vpop.eup %1571  ;;  %v1531_v0 = vclamps-f32 %v1007_v62, 30.0 }
 0x250   :  { %1346 = vst [vmem:[%s2129_s11 + $0x8] sm:$0xff] %v1572_v63 }
 0x251   :  { %v1343_v33 = vmul.f32 1.442695, %v1531_v0 }
 0x253   :  { %1575 = vpow2.f32 %v1343_v33 }
 0x254   :  { %v1574_v1 = vpop.eup %1573 }
 0x255   :  { %1347 = vst [vmem:[%s2129_s11 + $0x10] sm:$0xff] %v1574_v1 }
 0x259   :  { %v1576_v2 = vpop.eup %1575  ;;  %v1066_v8 = vpop.f32.mrf.mxu1 }
 0x25a   :  { %1348 = vst [vmem:[%s2129_s11 + $0x18] sm:$0xff] %v1576_v2  ;;  %v1067_v11 = vadd.f32 %v1066_v8, %v830_v6  ;;  %v2094_v2 = vld [vmem:[#allocation18 + $0x8] sm:$0xf] }
 0x25f   :  { %v1026_v4 = vpop.f32.mrf.mxu3 }
 0x260   :  { %v1027_v5 = vadd.f32 %v1026_v4, %v829_v3  ;;  %v1046_v7 = vpop.f32.mrf.mxu0 }
 0x262   :  { %v1047_v9 = vadd.f32 %v1046_v7, %v1027_v5  ;;  %v833_v5 = vperm.slane %v2094_v2, 0 }
 0x264   :  { %v1532_v10 = vmul.f32 -1.442695, %v1047_v9 }
 0x266   :  { %1577 = vpow2.f32 %v1532_v10  ;;  %v1086_v13 = vpop.f32.mrf.mxu2 }
 0x267   :  { %v1087_v14 = vadd.f32 %v1086_v13, %v1067_v11 }
 0x269   :  { %v1533_v15 = vmul.f32 -1.442695, %v1087_v14 }
 0x26b   :  { %1579 = vpow2.f32 %v1533_v15  ;;  %v834_v15 = vperm.slane %v2094_v2, 1 }
 0x26c   :  { %v1578_v16 = vpop.eup %1577 }
 0x26d   :  { %v1361_v17 = vadd.f32 1.0, %v1578_v16 }
 0x26f   :  { %1581 = vrcp.f32 %v1361_v17  ;;  %v1376_v24 = vand.u32 2147483648, %v1361_v17  ;;  %v1374_v27 = vand.u32 2147483647, %v1361_v17  ;;  %vm1370_vm15 = vweird.f32 %v1361_v17 }
 0x271   :  { %v1580_v18 = vpop.eup %1579  ;;  %v1377_v29 = vor.u32 1.1754944e-38, %v1376_v24  ;;  %vm1375_vm1 = vcmp.eq.f32.partialorder %v1374_v27, 8.507059e+37 }
 0x272   :  { %v1362_v19 = vadd.f32 1.0, %v1580_v18 }
 0x274   :  { %1583 = vrcp.f32 %v1362_v19  ;;  %v1391_v34 = vand.u32 2147483648, %v1362_v19  ;;  %v1389_v37 = vand.u32 2147483647, %v1362_v19  ;;  %vm1385_vm3 = vweird.f32 %v1362_v19 }
 0x275   :  { %v1582_v20 = vpop.eup %1581 }
 0x276   :  { %v1366_v22 = vmul.f32 %v1582_v20, %v1361_v17  ;;  %vm1371_vm14 = vweird.f32 %v1582_v20  ;;  %v1392_v40 = vor.u32 1.1754944e-38, %v1391_v34  ;;  %vm1390_vm5 = vcmp.eq.f32.partialorder %v1389_v37, 8.507059e+37 }
 0x277   :  { %vm1372_vm0 = vmor %vm1370_vm15, %vm1371_vm14 }
 0x278   :  { %v1367_v23 = vsub.f32 1.0, %v1366_v22 }
 0x27a   :  { %v1584_v25 = vpop.eup %1583  ;;  %v1368_v26 = vmul.f32 %v1582_v20, %v1367_v23 }
 0x27b   :  { %v1381_v12 = vmul.f32 %v1584_v25, %v1362_v19  ;;  %vm1386_vm2 = vweird.f32 %v1584_v25  ;;  %v1146_v47 = vpop.f32.mrf.mxu1 }
 0x27c   :  { %v1369_v28 = vadd.f32 %v1582_v20, %v1368_v26  ;;  %vm1387_vm4 = vmor %vm1385_vm3, %vm1386_vm2  ;;  %v1147_v50 = vadd.f32 %v1146_v47, %v832_v44  ;;  %v835_v44 = vperm.slane %v2094_v2, 2 }
 0x27d   :  { %v1382_v30 = vsub.f32 1.0, %v1381_v12 }
 0x27e   :  { %v1373_v32 = vsel %vm1372_vm0, %v1582_v20, %v1369_v28 }
 0x27f   :  { %v1378_v31 = vsel %vm1375_vm1, %v1377_v29, %v1373_v32  ;;  %v1383_v36 = vmul.f32 %v1584_v25, %v1382_v30 }
 0x280   :  { %1425 = vst [vmem:[%s2130_s12] sm:$0xff] %v1378_v31 }
 0x281   :  { %v1384_v38 = vadd.f32 %v1584_v25, %v1383_v36  ;;  %v1106_v39 = vpop.f32.mrf.mxu3 }
 0x282   :  { %v1107_v41 = vadd.f32 %v1106_v39, %v831_v35  ;;  %v1126_v45 = vpop.f32.mrf.mxu0 }
 0x283   :  { %v1388_v42 = vsel %vm1387_vm4, %v1584_v25, %v1384_v38 }
 0x284   :  { %v1393_v46 = vsel %vm1390_vm5, %v1392_v40, %v1388_v42  ;;  %v1127_v48 = vadd.f32 %v1126_v45, %v1107_v41 }
 0x285   :  { %1426 = vst [vmem:[%s2130_s12 + $0x8] sm:$0xff] %v1393_v46 }
 0x286   :  { %v1534_v49 = vmul.f32 -1.442695, %v1127_v48 }
 0x288   :  { %1585 = vpow2.f32 %v1534_v49  ;;  %v1166_v51 = vpop.f32.mrf.mxu2 }
 0x289   :  { %v1167_v52 = vadd.f32 %v1166_v51, %v1147_v50  ;;  %v836_v51 = vperm.slane %v2094_v2, 3 }
 0x28b   :  { %v1535_v21 = vmul.f32 -1.442695, %v1167_v52 }
 0x28d   :  { %1587 = vpow2.f32 %v1535_v21 }
 0x28e   :  { %v1586_v53 = vpop.eup %1585 }
 0x28f   :  { %v1363_v54 = vadd.f32 1.0, %v1586_v53 }
 0x291   :  { %1589 = vrcp.f32 %v1363_v54  ;;  %v1406_v59 = vand.u32 2147483648, %v1363_v54  ;;  %v1404_v62 = vand.u32 2147483647, %v1363_v54  ;;  %vm1400_vm7 = vweird.f32 %v1363_v54 }
 0x293   :  { %v1588_v55 = vpop.eup %1587  ;;  %v1407_v33 = vor.u32 1.1754944e-38, %v1406_v59  ;;  %vm1405_vm9 = vcmp.eq.f32.partialorder %v1404_v62, 8.507059e+37 }
 0x294   :  { %v1364_v43 = vadd.f32 1.0, %v1588_v55 }
 0x296   :  { %1591 = vrcp.f32 %v1364_v43  ;;  %v1421_v4 = vand.u32 2147483648, %v1364_v43  ;;  %v1419_v8 = vand.u32 2147483647, %v1364_v43  ;;  %vm1415_vm11 = vweird.f32 %v1364_v43 }
 0x297   :  { %v1590_v56 = vpop.eup %1589 }
 0x298   :  { %v1396_v57 = vmul.f32 %v1590_v56, %v1363_v54  ;;  %vm1401_vm6 = vweird.f32 %v1590_v56  ;;  %v1422_v11 = vor.u32 1.1754944e-38, %v1421_v4  ;;  %vm1420_vm13 = vcmp.eq.f32.partialorder %v1419_v8, 8.507059e+37 }
 0x299   :  { %vm1402_vm8 = vmor %vm1400_vm7, %vm1401_vm6 }
 0x29a   :  { %v1397_v58 = vsub.f32 1.0, %v1396_v57 }
 0x29c   :  { %v1592_v60 = vpop.eup %1591  ;;  %v1398_v61 = vmul.f32 %v1590_v56, %v1397_v58 }
 0x29d   :  { %v1411_v63 = vmul.f32 %v1592_v60, %v1364_v43  ;;  %vm1416_vm10 = vweird.f32 %v1592_v60  ;;  %v1226_v18 = vpop.f32.mrf.mxu1 }
 0x29e   :  { %v1399_v0 = vadd.f32 %v1590_v56, %v1398_v61  ;;  %vm1417_vm12 = vmor %vm1415_vm11, %vm1416_vm10  ;;  %v1227_v22 = vadd.f32 %v1226_v18, %v834_v15 }
 0x29f   :  { %v1412_v1 = vsub.f32 1.0, %v1411_v63 }
 0x2a0   :  { %v1403_v3 = vsel %vm1402_vm8, %v1590_v56, %v1399_v0 }
 0x2a1   :  { %v1408_v6 = vsel %vm1405_vm9, %v1407_v33, %v1403_v3  ;;  %v1413_v7 = vmul.f32 %v1592_v60, %v1412_v1 }
 0x2a2   :  { %1427 = vst [vmem:[%s2130_s12 + $0x10] sm:$0xff] %v1408_v6 }
 0x2a3   :  { %v1414_v9 = vadd.f32 %v1592_v60, %v1413_v7  ;;  %v1186_v10 = vpop.f32.mrf.mxu3 }
 0x2a4   :  { %v1187_v13 = vadd.f32 %v1186_v10, %v833_v5  ;;  %v1206_v16 = vpop.f32.mrf.mxu0 }
 0x2a5   :  { %v1418_v14 = vsel %vm1417_vm12, %v1592_v60, %v1414_v9 }
 0x2a6   :  { %v1423_v17 = vsel %vm1420_vm13, %v1422_v11, %v1418_v14  ;;  %v1207_v19 = vadd.f32 %v1206_v16, %v1187_v13 }
 0x2a7   :  { %1428 = vst [vmem:[%s2130_s12 + $0x18] sm:$0xff] %v1423_v17 }
 0x2a8   :  { %v1536_v20 = vmul.f32 -1.442695, %v1207_v19 }
 0x2aa   :  { %1593 = vpow2.f32 %v1536_v20  ;;  %v1246_v23 = vpop.f32.mrf.mxu2 }
 0x2ab   :  { %v1247_v24 = vadd.f32 %v1246_v23, %v1227_v22 }
 0x2ad   :  { %v1537_v25 = vmul.f32 -1.442695, %v1247_v24 }
 0x2af   :  { %1595 = vpow2.f32 %v1537_v25 }
 0x2b0   :  { %v1594_v26 = vpop.eup %1593 }
 0x2b1   :  { %v1441_v27 = vadd.f32 1.0, %v1594_v26 }
 0x2b3   :  { %1597 = vrcp.f32 %v1441_v27  ;;  %v1456_v34 = vand.u32 2147483648, %v1441_v27  ;;  %v1454_v36 = vand.u32 2147483647, %v1441_v27  ;;  %vm1450_vm15 = vweird.f32 %v1441_v27 }
 0x2b5   :  { %v1596_v12 = vpop.eup %1595  ;;  %v1457_v39 = vor.u32 1.1754944e-38, %v1456_v34  ;;  %vm1455_vm1 = vcmp.eq.f32.partialorder %v1454_v36, 8.507059e+37 }
 0x2b6   :  { %v1442_v28 = vadd.f32 1.0, %v1596_v12 }
 0x2b8   :  { %1599 = vrcp.f32 %v1442_v28  ;;  %v1471_v42 = vand.u32 2147483648, %v1442_v28  ;;  %v1469_v47 = vand.u32 2147483647, %v1442_v28  ;;  %vm1465_vm3 = vweird.f32 %v1442_v28 }
 0x2b9   :  { %v1598_v29 = vpop.eup %1597 }
 0x2ba   :  { %v1446_v30 = vmul.f32 %v1598_v29, %v1441_v27  ;;  %vm1451_vm14 = vweird.f32 %v1598_v29  ;;  %v1472_v50 = vor.u32 1.1754944e-38, %v1471_v42  ;;  %vm1470_vm5 = vcmp.eq.f32.partialorder %v1469_v47, 8.507059e+37 }
 0x2bb   :  { %vm1452_vm0 = vmor %vm1450_vm15, %vm1451_vm14 }
 0x2bc   :  { %v1447_v32 = vsub.f32 1.0, %v1446_v30 }
 0x2be   :  { %v1600_v35 = vpop.eup %1599  ;;  %v1448_v31 = vmul.f32 %v1598_v29, %v1447_v32 }
 0x2bf   :  { %v1461_v37 = vmul.f32 %v1600_v35, %v1442_v28  ;;  %vm1466_vm2 = vweird.f32 %v1600_v35  ;;  %v1306_v53 = vpop.f32.mrf.mxu1 }
 0x2c0   :  { %v1449_v38 = vadd.f32 %v1598_v29, %v1448_v31  ;;  %vm1467_vm4 = vmor %vm1465_vm3, %vm1466_vm2  ;;  %v1307_v56 = vadd.f32 %v1306_v53, %v836_v51 }
 0x2c1   :  { %v1462_v40 = vsub.f32 1.0, %v1461_v37 }
 0x2c2   :  { %v1453_v41 = vsel %vm1452_vm0, %v1598_v29, %v1449_v38 }
 0x2c3   :  { %v1458_v45 = vsel %vm1455_vm1, %v1457_v39, %v1453_v41  ;;  %v1463_v46 = vmul.f32 %v1600_v35, %v1462_v40 }
 0x2c4   :  { %1505 = vst [vmem:[%s2131_s13] sm:$0xff] %v1458_v45 }
 0x2c5   :  { %v1464_v48 = vadd.f32 %v1600_v35, %v1463_v46  ;;  %v1266_v49 = vpop.f32.mrf.mxu3  ;;  %v1286_v54 = vpop.f32.mrf.mxu0 }
 0x2c6   :  { %v1267_v52 = vadd.f32 %v1266_v49, %v835_v44 }
 0x2c7   :  { %v1468_v21 = vsel %vm1467_vm4, %v1600_v35, %v1464_v48 }
 0x2c8   :  { %v1473_v55 = vsel %vm1470_vm5, %v1472_v50, %v1468_v21  ;;  %v1287_v43 = vadd.f32 %v1286_v54, %v1267_v52 }
 0x2c9   :  { %1506 = vst [vmem:[%s2131_s13 + $0x8] sm:$0xff] %v1473_v55 }
 0x2ca   :  { %v1538_v57 = vmul.f32 -1.442695, %v1287_v43 }
 0x2cb   :  { %v1326_v58 = vpop.f32.mrf.mxu2 }
 0x2cc   :  { %1601 = vpow2.f32 %v1538_v57  ;;  %v1327_v59 = vadd.f32 %v1326_v58, %v1307_v56 }
 0x2ce   :  { %v1539_v60 = vmul.f32 -1.442695, %v1327_v59 }
 0x2d0   :  { %1603 = vpow2.f32 %v1539_v60 }
 0x2d2   :  { %v1602_v61 = vpop.eup %1601 }
 0x2d3   :  { %v1443_v62 = vadd.f32 1.0, %v1602_v61 }
 0x2d5   :  { %1605 = vrcp.f32 %v1443_v62  ;;  %v1484_v4 = vand.u32 2147483647, %v1443_v62  ;;  %v1486_v5 = vand.u32 2147483648, %v1443_v62  ;;  %vm1480_vm7 = vweird.f32 %v1443_v62 }
 0x2d6   :  { %v1604_v63 = vpop.eup %1603 }
 0x2d7   :  { %v1444_v0 = vadd.f32 1.0, %v1604_v63  ;;  %vm1485_vm9 = vcmp.eq.f32.partialorder %v1484_v4, 8.507059e+37  ;;  %v1487_v10 = vor.u32 1.1754944e-38, %v1486_v5 }
 0x2d9   :  { %1607 = vrcp.f32 %v1444_v0  ;;  %v1501_v11 = vand.u32 2147483648, %v1444_v0  ;;  %v1499_v15 = vand.u32 2147483647, %v1444_v0  ;;  %vm1495_vm11 = vweird.f32 %v1444_v0 }
 0x2db   :  { %v1606_v33 = vpop.eup %1605  ;;  %v1502_v18 = vor.u32 1.1754944e-38, %v1501_v11  ;;  %vm1500_vm13 = vcmp.eq.f32.partialorder %v1499_v15, 8.507059e+37 }
 0x2dc   :  { %v1476_v1 = vmul.f32 %v1606_v33, %v1443_v62  ;;  %vm1481_vm6 = vweird.f32 %v1606_v33 }
 0x2dd   :  { %vm1482_vm8 = vmor %vm1480_vm7, %vm1481_vm6 }
 0x2de   :  { %v1477_v2 = vsub.f32 1.0, %v1476_v1 }
 0x2df   :  { %v1608_v3 = vpop.eup %1607 }
 0x2e0   :  { %v1478_v6 = vmul.f32 %v1606_v33, %v1477_v2  ;;  %v1491_v7 = vmul.f32 %v1608_v3, %v1444_v0  ;;  %vm1496_vm10 = vweird.f32 %v1608_v3 }
 0x2e1   :  { %vm1497_vm12 = vmor %vm1495_vm11, %vm1496_vm10 }
 0x2e2   :  { %v1479_v8 = vadd.f32 %v1606_v33, %v1478_v6  ;;  %v1492_v9 = vsub.f32 1.0, %v1491_v7 }
 0x2e4   :  { %v1483_v13 = vsel %vm1482_vm8, %v1606_v33, %v1479_v8  ;;  %v1493_v14 = vmul.f32 %v1608_v3, %v1492_v9 }
 0x2e5   :  { %v1488_v16 = vsel %vm1485_vm9, %v1487_v10, %v1483_v13 }
 0x2e6   :  { %1507 = vst [vmem:[%s2131_s13 + $0x10] sm:$0xff] %v1488_v16  ;;  %v1494_v17 = vadd.f32 %v1608_v3, %v1493_v14 }
 0x2e8   :  { %v1498_v19 = vsel %vm1497_vm12, %v1608_v3, %v1494_v17 }
 0x2e9   :  { %v1503_v20 = vsel %vm1500_vm13, %v1502_v18, %v1498_v19 }
 0x2ea   :  { %1508 = vst [vmem:[%s2131_s13 + $0x18] sm:$0xff] %v1503_v20 }
 0x2eb   :  { %1521 = vsyncpa [#allocation3], 1 }
 0x2ec   :  { %1522 = vsyncpa [#allocation5], 1 }
 0x2ed   :  { %1523 = vsyncpa [#allocation8], 1 }
 0x2ee   :  { %1524 = vsyncpa [#allocation11], 1 }
 0x2ef   :  { %1525 = vsyncpa [#allocation14], 1 }
 0x2f0   :  { %1526 = vsyncpa [#allocation17], 1 }

</bundles_post_ra>
